<compile_context>
chip_gen: v7x
topology: tpu7x:2x2x1
jax: 0.10.0
libtpu: 0.0.40
codegen_flags: <defaults>
</compile_context>

<pallas_src>
import functools
import math

import jax
import jax.numpy as jnp
from jax.experimental import pallas as pl
from jax.experimental.pallas import tpu as pltpu

_LOG_2PI = math.log(2.0 * math.pi)


def _round_up(x, m):
    return ((x + m - 1) // m) * m


def _actor_kernel(obs_ref, eps_ref, w_ref, vec_ref,
                  mu_ref, act_ref, logp_ref, *, obs_dim, r1, hp, act_dim):
    # ---- packed params ----
    # w_ref  (r1 + 2*hp, hp) bf16 : rows [0:r1]=w1, [r1:r1+hp]=w2, [r1+hp:]=w3
    #                               (each zero padded to hp columns / rows)
    # vec_ref (8, hp) f32         : row0=b1, row1=b2, row2=b3, row3=log_std,
    #                               row4=low, row5=high, row6[0]=logp_const
    v = vec_ref[...]

    # ---- mu_net: Linear -> ReLU -> Linear -> ReLU -> Linear (identity) ----
    # bf16 MXU feed, f32 accumulate; zero-padded lanes stay zero through ReLU
    # and are ignored by the zero-padded rows of the next weight segment.
    x = obs_ref[...].astype(jnp.bfloat16)                    # (tb, obs_dim)
    if obs_dim != r1:                                        # static pad to w1 rows
        x = jnp.pad(x, ((0, 0), (0, r1 - obs_dim)))

    a1 = jnp.dot(x, w_ref[0:r1, :], preferred_element_type=jnp.float32)
    a1 = jnp.maximum(a1 + v[0:1, :], 0.0)                    # (tb, hp)
    a2 = jnp.dot(a1.astype(jnp.bfloat16), w_ref[r1:r1 + hp, :],
                 preferred_element_type=jnp.float32)
    a2 = jnp.maximum(a2 + v[1:2, :], 0.0)                    # (tb, hp)
    o3 = jnp.dot(a2.astype(jnp.bfloat16), w_ref[r1 + hp:r1 + 2 * hp, :],
                 preferred_element_type=jnp.float32)         # (tb, hp)
    o = o3[:, :act_dim] + v[2:3, :act_dim]                   # (tb, act_dim)

    # ---- squash + rescale into [action_low, action_high] ----
    # sigmoid(x) == 0.5*(tanh(x/2)+1): runs on the EUP slot.
    low = v[4:5, :act_dim]
    high = v[5:6, :act_dim]
    mu = low + (high - low) * (0.5 * (jnp.tanh(0.5 * o) + 1.0))

    # ---- Gaussian sample + log-prob ----
    std = jnp.exp(v[3:4, :act_dim])
    eps = eps_ref[...]
    act = mu + std * eps                                     # reparameterized sample

    # Normal(mu, std).log_prob(act).sum(-1): with act = mu + std*eps, z == eps.
    # Constant term (-sum(log_std) - 0.5*act_dim*log(2*pi)) precomputed in wrapper.
    logp = -0.5 * jnp.sum(eps * eps, axis=-1, keepdims=True) + v[6:7, 0:1]

    # ---- three direct full-ref stores (no zero-fill, no padded slab) ----
    mu_ref[...] = mu
    act_ref[...] = act
    logp_ref[...] = logp


def mlp_gaussian_actor_forward(obs, params, eps, *, block_b=2048):
    """Full forward pass in a single batch-tiled Pallas kernel.

    Returns (mu, act, logp_a); (mu, exp(log_std)) describe the torch module's
    returned Normal distribution `pi`.
    """
    B, obs_dim = obs.shape
    act_dim = eps.shape[-1]
    w_pack = params["w_pack"]
    vec_pack = params["vec_pack"]
    hp = w_pack.shape[1]
    r1 = w_pack.shape[0] - 2 * hp

    # Tile choice: big tiles amortize the ~0.35us per-grid-step overhead, but
    # keep >= 4 grid steps when the batch allows it so v7x's two TensorCores
    # each get >= 2 steps (pipelined DMA/compute per core).
    tb = max(8, min(block_b, _round_up(B, 8)))
    min_tiles = 4
    if (B + tb - 1) // tb < min_tiles and B >= min_tiles * 8:
        tb = _round_up((B + min_tiles - 1) // min_tiles, 8)
    grid = (pl.cdiv(B, tb),)
    # Note: if B % tb != 0 the padded rows of the last tile compute on stale
    # buffer contents; their results are masked out of the output writeback.

    def tiled(shape):
        return pl.BlockSpec(shape, lambda i: (i, 0))

    def resident(shape):
        # Constant block index: DMA'd once, stays resident in VMEM across tiles.
        return pl.BlockSpec(shape, lambda i: (0, 0))

    kernel = functools.partial(_actor_kernel, obs_dim=obs_dim, r1=r1, hp=hp,
                               act_dim=act_dim)

    mu, act, logp = pl.pallas_call(
        kernel,
        grid=grid,
        in_specs=[
            tiled((tb, obs_dim)),
            tiled((tb, act_dim)),
            resident(w_pack.shape),
            resident(vec_pack.shape),
        ],
        out_specs=(
            pl.BlockSpec((tb, act_dim), lambda i: (i, 0)),
            pl.BlockSpec((tb, act_dim), lambda i: (i, 0)),
            pl.BlockSpec((tb, 1), lambda i: (i, 0)),
        ),
        out_shape=(
            jax.ShapeDtypeStruct((B, act_dim), jnp.float32),
            jax.ShapeDtypeStruct((B, act_dim), jnp.float32),
            jax.ShapeDtypeStruct((B, 1), jnp.float32),
        ),
        compiler_params=pltpu.CompilerParams(
            dimension_semantics=("parallel",)),   # batch axis -> both TCs on v7x
    )(obs, eps, w_pack, vec_pack)

    return mu, act, logp[:, 0]


def _xavier_normal(key, fan_in, fan_out):
    # torch.nn.init.xavier_normal_: std = sqrt(2 / (fan_in + fan_out))
    std = math.sqrt(2.0 / (fan_in + fan_out))
    # stored as (in, out): equals torch (out, in) weight transposed
    return std * jax.random.normal(key, (fan_in, fan_out), dtype=jnp.float32)


def init_params(key, obs_dim, hidden_sizes, act_dim, action_low, action_high):
    assert len(hidden_sizes) == 2, "kernel is specialized to two hidden layers"
    h1, h2 = hidden_sizes
    keys = jax.random.split(key, 3)
    w1 = _xavier_normal(keys[0], obs_dim, h1)
    w2 = _xavier_normal(keys[1], h1, h2)
    w3 = _xavier_normal(keys[2], h2, act_dim)

    # Pack the three weights into ONE resident bf16 array.  Segment row counts
    # are multiples of 16 (bf16 sublane-packed tile) so the in-kernel static
    # row slices land on clean boundaries; columns padded to a common width.
    r1 = _round_up(obs_dim, 16)
    hp = _round_up(max(h1, h2, act_dim), 16)

    def pad2(w, rows, cols):
        return jnp.pad(w, ((0, rows - w.shape[0]), (0, cols - w.shape[1])))

    w_pack = jnp.concatenate(
        [pad2(w1, r1, hp), pad2(w2, hp, hp), pad2(w3, hp, hp)],
        axis=0).astype(jnp.bfloat16)                      # (r1 + 2*hp, hp)

    # Pack every small vector into ONE resident f32 array (biases are 0.0).
    log_std = jnp.full((act_dim,), -0.5, jnp.float32)
    low = jnp.asarray(action_low, jnp.float32).reshape(act_dim)
    high = jnp.asarray(action_high, jnp.float32).reshape(act_dim)
    logp_const = -jnp.sum(log_std) - 0.5 * act_dim * _LOG_2PI

    vec = jnp.zeros((8, hp), jnp.float32)                 # rows 0/1/2: b1/b2/b3 = 0
    vec = vec.at[3, :act_dim].set(log_std)
    vec = vec.at[4, :act_dim].set(low)
    vec = vec.at[5, :act_dim].set(high)
    vec = vec.at[6, 0].set(logp_const)

    return {"w_pack": w_pack, "vec_pack": vec}


def ref_forward(obs, params, eps):
    """Pure-JAX reference mirroring the kernel numerics (bf16 MXU feed, f32 epilogue)."""
    w = params["w_pack"]
    v = params["vec_pack"]
    hp = w.shape[1]
    r1 = w.shape[0] - 2 * hp
    act_dim = eps.shape[-1]

    x = obs.astype(jnp.bfloat16)
    if obs.shape[1] != r1:
        x = jnp.pad(x, ((0, 0), (0, r1 - obs.shape[1])))
    a1 = jnp.maximum(jnp.dot(x, w[:r1], preferred_element_type=jnp.float32) + v[0:1], 0.0)
    a2 = jnp.maximum(jnp.dot(a1.astype(jnp.bfloat16), w[r1:r1 + hp],
                             preferred_element_type=jnp.float32) + v[1:2], 0.0)
    o = jnp.dot(a2.astype(jnp.bfloat16), w[r1 + hp:],
                preferred_element_type=jnp.float32)[:, :act_dim] + v[2:3, :act_dim]

    log_std = v[3:4, :act_dim]
    low = v[4:5, :act_dim]
    high = v[5:6, :act_dim]
    mu = low + (high - low) * jax.nn.sigmoid(o)
    std = jnp.exp(log_std)
    act = mu + std * eps
    logp = (-0.5 * ((act - mu) / std) ** 2 - log_std - 0.5 * _LOG_2PI).sum(-1)
    return mu, act, logp


if __name__ == "__main__":
    obs_dim, act_dim = 16, 4
    hidden_sizes = (32, 32)
    batch = 1024          # -> grid of 4 tiles of 256 rows (2 per TC on v7x)

    key = jax.random.PRNGKey(0)
    k_param, k_obs, k_eps = jax.random.split(key, 3)

    params = init_params(
        k_param, obs_dim, hidden_sizes, act_dim,
        action_low=[-1.0, -1.0, -2.0, -2.0],
        action_high=[1.0, 1.0, 2.0, 2.0],
    )
    obs = jax.random.normal(k_obs, (batch, obs_dim), dtype=jnp.float32)
    eps = jax.random.normal(k_eps, (batch, act_dim), dtype=jnp.float32)  # pi.sample() noise

    fwd = jax.jit(mlp_gaussian_actor_forward)
    mu, act, logp_a = fwd(obs, params, eps)
    jax.block_until_ready((mu, act, logp_a))

    mu_r, act_r, logp_r = ref_forward(obs, params, eps)
    assert mu.shape == (batch, act_dim)
    assert act.shape == (batch, act_dim)
    assert logp_a.shape == (batch,)
    assert jnp.allclose(mu, mu_r, atol=2e-3), float(jnp.max(jnp.abs(mu - mu_r)))
    assert jnp.allclose(act, act_r, atol=2e-3), float(jnp.max(jnp.abs(act - act_r)))
    assert jnp.allclose(logp_a, logp_r, atol=1e-3), float(jnp.max(jnp.abs(logp_a - logp_r)))

    print("KERNEL_OK")
</pallas_src>

<mosaic_0001>
module attributes {stable_mosaic.version = 11 : i64} {
  func.func @_actor_kernel(%arg0: i32, %arg1: memref<256x16xf32, #tpu.memory_space<vmem>>, %arg2: memref<256x4xf32, #tpu.memory_space<vmem>>, %arg3: memref<80x32xbf16, #tpu.memory_space<vmem>>, %arg4: memref<8x32xf32, #tpu.memory_space<vmem>>, %arg5: memref<256x4xf32, #tpu.memory_space<vmem>>, %arg6: memref<256x4xf32, #tpu.memory_space<vmem>>, %arg7: memref<256x1xf32, #tpu.memory_space<vmem>>) attributes {dimension_semantics = [#tpu.dimension_semantics<parallel>], iteration_bounds = array<i64: 4>, scalar_prefetch = 0 : i64, scratch_operands = 0 : i64, tpu.core_type = #tpu.core_type<tc>, window_params = [{transform_indices = @transform_0, window_bounds = array<i64: 256, 16>}, {transform_indices = @transform_1, window_bounds = array<i64: 256, 4>}, {pipeline_mode = #tpu.pipeline_mode<synchronous>, transform_indices = @transform_2, window_bounds = array<i64: 80, 32>}, {pipeline_mode = #tpu.pipeline_mode<synchronous>, transform_indices = @transform_3, window_bounds = array<i64: 8, 32>}, {transform_indices = @transform_4, window_bounds = array<i64: 256, 4>}, {transform_indices = @transform_5, window_bounds = array<i64: 256, 4>}, {transform_indices = @transform_6, window_bounds = array<i64: 256, 1>}]} {
    %c0 = arith.constant 0 : index
    %c0_0 = arith.constant 0 : index
    %0 = vector.load %arg4[%c0, %c0_0] : memref<8x32xf32, #tpu.memory_space<vmem>>, vector<8x32xf32>
    %c0_1 = arith.constant 0 : index
    %c0_2 = arith.constant 0 : index
    %1 = vector.load %arg1[%c0_1, %c0_2] : memref<256x16xf32, #tpu.memory_space<vmem>>, vector<256x16xf32>
    %2 = arith.truncf %1 : vector<256x16xf32> to vector<256x16xbf16>
    %c0_3 = arith.constant 0 : index
    %c0_4 = arith.constant 0 : index
    %3 = vector.load %arg3[%c0_3, %c0_4] : memref<80x32xbf16, #tpu.memory_space<vmem>>, vector<16x32xbf16>
    %cst = arith.constant dense<0.000000e+00> : vector<256x32xf32>
    %4 = tpu.matmul %2, %3, %cst {dimension_numbers = #tpu.dot_dimension_numbers<[1], [0], [0], [1], [0, 0, 1, 1], [], []>} : vector<256x16xbf16>, vector<16x32xbf16>, vector<256x32xf32> -> vector<256x32xf32>
    %5 = vector.extract_strided_slice %0 {offsets = [0, 0], sizes = [1, 32], strides = [1, 1]} : vector<8x32xf32> to vector<1x32xf32>
    %6 = vector.broadcast %5 : vector<1x32xf32> to vector<256x32xf32>
    %7 = arith.addf %4, %6 : vector<256x32xf32>
    %cst_5 = arith.constant 0.000000e+00 : f32
    %8 = vector.broadcast %cst_5 : f32 to vector<256x32xf32>
    %9 = arith.maximumf %7, %8 : vector<256x32xf32>
    %10 = arith.truncf %9 : vector<256x32xf32> to vector<256x32xbf16>
    %c16 = arith.constant 16 : index
    %c0_6 = arith.constant 0 : index
    %11 = vector.load %arg3[%c16, %c0_6] : memref<80x32xbf16, #tpu.memory_space<vmem>>, vector<32x32xbf16>
    %cst_7 = arith.constant dense<0.000000e+00> : vector<256x32xf32>
    %12 = tpu.matmul %10, %11, %cst_7 {dimension_numbers = #tpu.dot_dimension_numbers<[1], [0], [0], [1], [0, 0, 1, 1], [], []>} : vector<256x32xbf16>, vector<32x32xbf16>, vector<256x32xf32> -> vector<256x32xf32>
    %13 = vector.extract_strided_slice %0 {offsets = [1, 0], sizes = [1, 32], strides = [1, 1]} : vector<8x32xf32> to vector<1x32xf32>
    %14 = vector.broadcast %13 : vector<1x32xf32> to vector<256x32xf32>
    %15 = arith.addf %12, %14 : vector<256x32xf32>
    %cst_8 = arith.constant 0.000000e+00 : f32
    %16 = vector.broadcast %cst_8 : f32 to vector<256x32xf32>
    %17 = arith.maximumf %15, %16 : vector<256x32xf32>
    %18 = arith.truncf %17 : vector<256x32xf32> to vector<256x32xbf16>
    %c48 = arith.constant 48 : index
    %c0_9 = arith.constant 0 : index
    %19 = vector.load %arg3[%c48, %c0_9] : memref<80x32xbf16, #tpu.memory_space<vmem>>, vector<32x32xbf16>
    %cst_10 = arith.constant dense<0.000000e+00> : vector<256x32xf32>
    %20 = tpu.matmul %18, %19, %cst_10 {dimension_numbers = #tpu.dot_dimension_numbers<[1], [0], [0], [1], [0, 0, 1, 1], [], []>} : vector<256x32xbf16>, vector<32x32xbf16>, vector<256x32xf32> -> vector<256x32xf32>
    %21 = vector.extract_strided_slice %20 {offsets = [0, 0], sizes = [256, 4], strides = [1, 1]} : vector<256x32xf32> to vector<256x4xf32>
    %22 = vector.extract_strided_slice %0 {offsets = [2, 0], sizes = [1, 4], strides = [1, 1]} : vector<8x32xf32> to vector<1x4xf32>
    %23 = vector.broadcast %22 : vector<1x4xf32> to vector<256x4xf32>
    %24 = arith.addf %21, %23 : vector<256x4xf32>
    %25 = vector.extract_strided_slice %0 {offsets = [4, 0], sizes = [1, 4], strides = [1, 1]} : vector<8x32xf32> to vector<1x4xf32>
    %26 = vector.extract_strided_slice %0 {offsets = [5, 0], sizes = [1, 4], strides = [1, 1]} : vector<8x32xf32> to vector<1x4xf32>
    %27 = arith.subf %26, %25 : vector<1x4xf32>
    %cst_11 = arith.constant 5.000000e-01 : f32
    %28 = vector.broadcast %cst_11 : f32 to vector<256x4xf32>
    %29 = arith.mulf %28, %24 : vector<256x4xf32>
    %30 = math.tanh %29 : vector<256x4xf32>
    %cst_12 = arith.constant 1.000000e+00 : f32
    %31 = vector.broadcast %cst_12 : f32 to vector<256x4xf32>
    %32 = arith.addf %30, %31 : vector<256x4xf32>
    %cst_13 = arith.constant 5.000000e-01 : f32
    %33 = vector.broadcast %cst_13 : f32 to vector<256x4xf32>
    %34 = arith.mulf %33, %32 : vector<256x4xf32>
    %35 = vector.broadcast %27 : vector<1x4xf32> to vector<256x4xf32>
    %36 = arith.mulf %35, %34 : vector<256x4xf32>
    %37 = vector.broadcast %25 : vector<1x4xf32> to vector<256x4xf32>
    %38 = arith.addf %37, %36 : vector<256x4xf32>
    %39 = vector.extract_strided_slice %0 {offsets = [3, 0], sizes = [1, 4], strides = [1, 1]} : vector<8x32xf32> to vector<1x4xf32>
    %40 = math.exp %39 : vector<1x4xf32>
    %c0_14 = arith.constant 0 : index
    %c0_15 = arith.constant 0 : index
    %41 = vector.load %arg2[%c0_14, %c0_15] : memref<256x4xf32, #tpu.memory_space<vmem>>, vector<256x4xf32>
    %42 = vector.broadcast %40 : vector<1x4xf32> to vector<256x4xf32>
    %43 = arith.mulf %42, %41 : vector<256x4xf32>
    %44 = arith.addf %38, %43 : vector<256x4xf32>
    %45 = arith.mulf %41, %41 : vector<256x4xf32>
    %cst_16 = arith.constant dense<0.000000e+00> : vector<256xf32>
    %46 = vector.multi_reduction <add>, %45, %cst_16 [1] : vector<256x4xf32> to vector<256xf32>
    %47 = vector.shape_cast %46 : vector<256xf32> to vector<256x1xf32>
    %cst_17 = arith.constant -5.000000e-01 : f32
    %48 = vector.broadcast %cst_17 : f32 to vector<256x1xf32>
    %49 = arith.mulf %48, %47 : vector<256x1xf32>
    %50 = vector.extract_strided_slice %0 {offsets = [6, 0], sizes = [1, 1], strides = [1, 1]} : vector<8x32xf32> to vector<1x1xf32>
    %51 = vector.broadcast %50 : vector<1x1xf32> to vector<256x1xf32>
    %52 = arith.addf %49, %51 : vector<256x1xf32>
    %c0_18 = arith.constant 0 : index
    %c0_19 = arith.constant 0 : index
    %53 = vector.load %arg5[%c0_18, %c0_19] : memref<256x4xf32, #tpu.memory_space<vmem>>, vector<256x4xf32>
    tpu.vector_store %arg5[%c0_18, %c0_19], %38 {strides = array<i32>} : memref<256x4xf32, #tpu.memory_space<vmem>>, vector<256x4xf32>,
    %c0_20 = arith.constant 0 : index
    %c0_21 = arith.constant 0 : index
    %54 = vector.load %arg6[%c0_20, %c0_21] : memref<256x4xf32, #tpu.memory_space<vmem>>, vector<256x4xf32>
    tpu.vector_store %arg6[%c0_20, %c0_21], %44 {strides = array<i32>} : memref<256x4xf32, #tpu.memory_space<vmem>>, vector<256x4xf32>,
    %c0_22 = arith.constant 0 : index
    %c0_23 = arith.constant 0 : index
    %55 = vector.load %arg7[%c0_22, %c0_23] : memref<256x1xf32, #tpu.memory_space<vmem>>, vector<256x1xf32>
    tpu.vector_store %arg7[%c0_22, %c0_23], %52 {strides = array<i32>} : memref<256x1xf32, #tpu.memory_space<vmem>>, vector<256x1xf32>,
    return
  }
  func.func @transform_0(%arg0: i32) -> (i32, i32) {
    %c0_i32 = arith.constant 0 : i32
    %c0_i32_0 = arith.constant 0 : i32
    return %arg0, %c0_i32 : i32, i32
  }
  func.func @transform_1(%arg0: i32) -> (i32, i32) {
    %c0_i32 = arith.constant 0 : i32
    %c0_i32_0 = arith.constant 0 : i32
    return %arg0, %c0_i32 : i32, i32
  }
  func.func @transform_2(%arg0: i32) -> (i32, i32) {
    %c0_i32 = arith.constant 0 : i32
    %c0_i32_0 = arith.constant 0 : i32
    %c0_i32_1 = arith.constant 0 : i32
    return %c0_i32, %c0_i32_0 : i32, i32
  }
  func.func @transform_3(%arg0: i32) -> (i32, i32) {
    %c0_i32 = arith.constant 0 : i32
    %c0_i32_0 = arith.constant 0 : i32
    %c0_i32_1 = arith.constant 0 : i32
    return %c0_i32, %c0_i32_0 : i32, i32
  }
  func.func @transform_4(%arg0: i32) -> (i32, i32) {
    %c0_i32 = arith.constant 0 : i32
    %c0_i32_0 = arith.constant 0 : i32
    return %arg0, %c0_i32 : i32, i32
  }
  func.func @transform_5(%arg0: i32) -> (i32, i32) {
    %c0_i32 = arith.constant 0 : i32
    %c0_i32_0 = arith.constant 0 : i32
    return %arg0, %c0_i32 : i32, i32
  }
  func.func @transform_6(%arg0: i32) -> (i32, i32) {
    %c0_i32 = arith.constant 0 : i32
    %c0_i32_0 = arith.constant 0 : i32
    return %arg0, %c0_i32 : i32, i32
  }
}

</mosaic_0001>

<bundles_post_ra>
// kernel: mlp_gaussian_actor_forward.1
= control target key start
LH: loop header
LB: loop body
LE: loop exit
PB: predicated region body
PF: predicated region fallthrough
CT: control target
= control target key end

     0   :  { %s2265_s21 = smov 0   ;;  %s3108_s0 = inlined_call_operand.vmem [shape: f32[1024,16], index: 0, kind: input, shape index: {}]   ;;  %s3109_s1 = inlined_call_operand.vmem [shape: f32[1024,4], index: 1, kind: input, shape index: {}]   ;;  %s3110_s2 = inlined_call_operand.vmem [shape: bf16[80,32], index: 2, kind: input, shape index: {}]   ;;  %s3111_s3 = inlined_call_operand.vmem [shape: f32[8,32], index: 3, kind: input, shape index: {}]   ;;  %s3112_s4 = inlined_call_operand.vmem [shape: f32[1024,4], index: 4, kind: output, shape index: {0}]   ;;  %s3113_s5 = inlined_call_operand.vmem [shape: f32[1024,4], index: 5, kind: output, shape index: {1}]   ;;  %s3114_s6 = inlined_call_operand.vmem [shape: f32[1024,1], index: 6, kind: output, shape index: {2}]  }
   0x1 LB: > { %s1899_s22 = sadd.s32 4294967295, %s2228_s21   ;;  %p1903_p0 = scmp.ge.s32.totalorder %s2228_s21, 1  ;;  %s2228_s21 = sphi %s2265_s21, %s17_s21  }
   0x2   : > { %p229_p1 = scmp.lt.s32.totalorder %s2228_s21, 5 }
   0x4   : > { %p230_p2 = pnand %p1903_p0, %p229_p1 }
   0x5   : > { %v2138_v0 = vld [vmem:[%s3110_s2] sm:$0xff] (!%p230_p2)   ;;  %s1904_s25 = sshll.u32 (!%p230_p2), %s1899_s22, 5  ;;  %v2139_v1 = vld [vmem:[%s3110_s2 + $0x8] sm:$0xff] (!%p230_p2)   ;;  %vm366_vm0 = vcmask (!%p230_p2), 130048   ;;  %v2140_v23 = vld [vmem:[%s3110_s2 + $0x10] sm:$0xff] (!%p230_p2)   ;;  %v356_v53 = vlaneseq (!%p230_p2)  ;;  %vm644_vm1 = vcmask (!%p230_p2), 261120  }
   0x6   : > { %233 = sbr.rel (%p230_p2) target bundleno = 763 (0x2fb), region = 36  ;;  %p275_p3 = scmp.lt.s32.totalorder (!%p230_p2), %s1904_s25, 127  ;;  %2022 = vmatprep.subr.bf16.mxu0 (!%p230_p2), %v2138_v0  ;;  %2128 = vmatprep.subr.bf16.mxu1 (!%p230_p2), %v2138_v0  ;;  %v2141_v51 = vld [vmem:[%s3110_s2 + $0x18] sm:$0xff] (!%p230_p2)   ;;  %v2142_v52 = vld [vmem:[%s3110_s2 + $0x20] sm:$0xff] (!%p230_p2)   ;;  %vm1501_vm2 = vcmask (!%p230_p2), 31744   ;;  %vm1730_vm3 = vcmask (!%p230_p2), 7168  }
   0x7   : > { %2023 = vmatpush3.bf16.msra.mxu0 (!%p230_p2), %v2138_v0  ;;  %2129 = vmatpush3.bf16.msra.mxu1 (!%p230_p2), %v2138_v0  ;;  %v2344_v54 = vshrl.u32 (!%p230_p2), %v356_v53, 7  ;;  %v2350_v56 = vld [vmem:[%s3111_s3] sm:$0xff] (!%p230_p2) }
   0x8   : > { %2056 = vmatprep.subr.bf16.mxu1 (!%p230_p2), %v2139_v1  ;;  %2092 = vmatprep.subr.bf16.mxu0 (!%p230_p2), %v2141_v51 }
   0x9   : > { %v358_v55 = vsub.s32 (!%p230_p2), 0, %v2344_v54 }
   0xb   : > { %v2353_v57 = vrot.slane (!%p230_p2), %v2350_v56, %v358_v55 }
   0xd   : > { %s3116_s25 = smov (!%p275_p3, %s1904_s25), 127 }
   0xe   : > { %s2279_s28 = sshll.u32 %s3116_s25, 3 }
   0xf   : > { %s2285_s7 = scalar_lea.vmem %s3108_s0, %s2279_s28  ;;  %s2413_s18 = scalar_lea.vmem %s3109_s1, %s2279_s28 }
  0x10   : > { %v306_v2 = vld [vmem:[%s2285_s7] sm:$0xff]  ;;  %v307_v3 = vld [vmem:[%s2285_s7 + $0x8] sm:$0xff]  ;;  %v308_v4 = vld [vmem:[%s2285_s7 + $0x10] sm:$0xff]  ;;  %s2621_s22 = scalar_lea.vmem %s3114_s6, %s2279_s28  ;;  %s2828_s27 = scalar_lea.vmem %s3112_s4, %s2279_s28 }
  0x11   : > { %v338_v5 = vpack.c.bf16 %v307_v3, %v306_v2  ;;  %v309_v6 = vld [vmem:[%s2285_s7 + $0x18] sm:$0xff]  ;;  %v310_v7 = vld [vmem:[%s2285_s7 + $0x20] sm:$0xff]  ;;  %v311_v8 = vld [vmem:[%s2285_s7 + $0x28] sm:$0xff] }
  0x12   : > { %v339_v9 = vpack.c.bf16 %v309_v6, %v308_v4  ;;  %v340_v10 = vpack.c.bf16 %v311_v8, %v310_v7  ;;  %v312_v11 = vld [vmem:[%s2285_s7 + $0x30] sm:$0xff]  ;;  %v313_v12 = vld [vmem:[%s2285_s7 + $0x38] sm:$0xff]  ;;  %v314_v13 = vld [vmem:[%s2285_s7 + $0x40] sm:$0xff] }
  0x13   : > { %2024 = vmatprep.mubr.msk.bf16.mxu0 %vm366_vm0, %v338_v5  ;;  %v315_v14 = vld [vmem:[%s2285_s7 + $0x48] sm:$0xff]  ;;  %v322_v15 = vld [vmem:[%s2285_s7 + $0x80] sm:$0xff]  ;;  %v324_v18 = vld [vmem:[%s2285_s7 + $0x90] sm:$0xff]  ;;  %v341_v24 = vpack.c.bf16 %v313_v12, %v312_v11 }
  0x14   : > { %2025 = vmatmul.mubr.msk.bf16.vlgmr.msra.gmra.mrb[0].mxu0 %vm366_vm0, %v339_v9  ;;  %v323_v16 = vld [vmem:[%s2285_s7 + $0x88] sm:$0xff]  ;;  %v325_v19 = vld [vmem:[%s2285_s7 + $0x98] sm:$0xff]  ;;  %v326_v20 = vld [vmem:[%s2285_s7 + $0xa0] sm:$0xff]  ;;  %v342_v26 = vpack.c.bf16 %v315_v14, %v314_v13 }
  0x15   : > { %2028 = vmatprep.mubr.msk.bf16.mxu0 %vm366_vm0, %v340_v10  ;;  %v346_v17 = vpack.c.bf16 %v323_v16, %v322_v15  ;;  %v347_v21 = vpack.c.bf16 %v325_v19, %v324_v18  ;;  %v327_v22 = vld [vmem:[%s2285_s7 + $0xa8] sm:$0xff]  ;;  %v328_v27 = vld [vmem:[%s2285_s7 + $0xb0] sm:$0xff]  ;;  %v329_v28 = vld [vmem:[%s2285_s7 + $0xb8] sm:$0xff]  ;;  %2093 = vmatpush3.bf16.msra.mxu0 %v2141_v51 }
  0x16   : > { %v348_v25 = vpack.c.bf16 %v327_v22, %v326_v20  ;;  %v330_v29 = vld [vmem:[%s2285_s7 + $0xc0] sm:$0xff]  ;;  %v331_v30 = vld [vmem:[%s2285_s7 + $0xc8] sm:$0xff]  ;;  %v316_v31 = vld [vmem:[%s2285_s7 + $0x50] sm:$0xff]  ;;  %v349_v33 = vpack.c.bf16 %v329_v28, %v328_v27  ;;  %2094 = vmatprep.subr.bf16.mxu0 %v2142_v52 }
  0x17   : > { %2040 = vmatprep.mubr.msk.bf16.mxu1 %vm366_vm0, %v346_v17  ;;  %v317_v32 = vld [vmem:[%s2285_s7 + $0x58] sm:$0xff]  ;;  %v318_v34 = vld [vmem:[%s2285_s7 + $0x60] sm:$0xff]  ;;  %v319_v35 = vld [vmem:[%s2285_s7 + $0x68] sm:$0xff]  ;;  %v350_v36 = vpack.c.bf16 %v331_v30, %v330_v29 }
  0x18   : > { %2041 = vmatmul.mubr.msk.bf16.vlgmr.msra.gmra.mrb[0].mxu1 %vm366_vm0, %v347_v21  ;;  %v343_v37 = vpack.c.bf16 %v317_v32, %v316_v31  ;;  %v344_v38 = vpack.c.bf16 %v319_v35, %v318_v34  ;;  %v332_v39 = vld [vmem:[%s2285_s7 + $0xd0] sm:$0xff]  ;;  %v333_v40 = vld [vmem:[%s2285_s7 + $0xd8] sm:$0xff]  ;;  %v334_v41 = vld [vmem:[%s2285_s7 + $0xe0] sm:$0xff] }
  0x19   : > { %2044 = vmatprep.mubr.msk.bf16.mxu1 %vm366_vm0, %v348_v25  ;;  %2057 = vmatpush3.bf16.msra.mxu1 %v2139_v1  ;;  %v335_v42 = vld [vmem:[%s2285_s7 + $0xe8] sm:$0xff]  ;;  %v320_v43 = vld [vmem:[%s2285_s7 + $0x70] sm:$0xff]  ;;  %v321_v44 = vld [vmem:[%s2285_s7 + $0x78] sm:$0xff]  ;;  %v351_v45 = vpack.c.bf16 %v333_v40, %v332_v39 }
  0x1a   : > { %2058 = vmatprep.subr.bf16.mxu1 %v2140_v23  ;;  %v352_v46 = vpack.c.bf16 %v335_v42, %v334_v41  ;;  %v345_v47 = vpack.c.bf16 %v321_v44, %v320_v43  ;;  %v336_v48 = vld [vmem:[%s2285_s7 + $0xf0] sm:$0xff]  ;;  %v337_v49 = vld [vmem:[%s2285_s7 + $0xf8] sm:$0xff]  ;;  %2095 = vmatpush3.bf16.msra.mxu0 %v2142_v52  ;;  %s2841_s7 = scalar_lea.vmem %s3113_s5, %s2279_s28 }
  0x1b   : > { %v353_v50 = vpack.c.bf16 %v337_v49, %v336_v48 }
  0x1c   : > { %2029 = vmatmul.mubr.msk.bf16.gmra.mrb[4].mxu0 %vm366_vm0, %v341_v24 }
  0x1d   : > { %2032 = vmatprep.mubr.msk.bf16.mxu0 %vm366_vm0, %v342_v26  ;;  %2059 = vmatpush3.bf16.msra.mxu1 %v2140_v23 }
  0x20   : > { %2045 = vmatmul.mubr.msk.bf16.gmra.mrb[4].mxu1 %vm366_vm0, %v349_v33 }
  0x21   : > { %2048 = vmatprep.mubr.msk.bf16.mxu1 %vm366_vm0, %v350_v36 }
  0x24   : > { %2033 = vmatmul.mubr.msk.bf16.gmra.mrb[8].mxu0 %vm366_vm0, %v343_v37 }
  0x25   : > { %2036 = vmatprep.mubr.msk.bf16.mxu0 %vm366_vm0, %v344_v38 }
  0x28   : > { %2049 = vmatmul.mubr.msk.bf16.gmra.mrb[8].mxu1 %vm366_vm0, %v351_v45 }
  0x29   : > { %2052 = vmatprep.mubr.msk.bf16.mxu1 %vm366_vm0, %v352_v46 }
  0x2c   : > { %2037 = vmatmul.mubr.msk.bf16.gmra.mrb[12].mxu0 %vm366_vm0, %v345_v47 }
  0x30   : > { %2053 = vmatmul.mubr.msk.bf16.gmra.mrb[12].mxu1 %vm366_vm0, %v353_v50 }
  0xe7   : > { %v2026_v58 = vpop.f32.mrb[0].mxu0 }
  0xe8   : > { %v458_v59 = vadd.f32 %v2026_v58, %v2353_v57  ;;  %v449_v60 = vpop.f32.mrb[1].mxu0 }
  0xe9   : > { %v450_v61 = vadd.f32 %v449_v60, %v2353_v57  ;;  %v2027_v62 = vpop.f32.mrb[2].mxu0 }
  0xea   : > { %v461_v63 = vadd.f32 %v2027_v62, %v2353_v57  ;;  %v452_v0 = vpop.f32.mrb[3].mxu0  ;;  %v578_v2 = vmax.f32 %v458_v59, 0.0 }
  0xeb   : > { %v453_v1 = vadd.f32 %v452_v0, %v2353_v57  ;;  %v2042_v4 = vpop.f32.mrb[0].mxu1  ;;  %v576_v5 = vmax.f32 %v450_v61, 0.0 }
  0xec   : > { %v579_v3 = vmax.f32 %v461_v63, 0.0  ;;  %v522_v7 = vadd.f32 %v2042_v4, %v2353_v57  ;;  %v513_v8 = vpop.f32.mrb[1].mxu1 }
  0xed   : > { %v577_v6 = vmax.f32 %v453_v1, 0.0  ;;  %v514_v10 = vadd.f32 %v513_v8, %v2353_v57  ;;  %v2043_v11 = vpop.f32.mrb[2].mxu1 }
  0xee   : > { %v609_v9 = vpack.c.bf16 %v579_v3, %v578_v2  ;;  %v594_v14 = vmax.f32 %v522_v7, 0.0  ;;  %v525_v15 = vadd.f32 %v2043_v11, %v2353_v57  ;;  %v516_v16 = vpop.f32.mrb[3].mxu1 }
  0xef   : > { %v608_v12 = vpack.c.bf16 %v577_v6, %v576_v5  ;;  %v2030_v13 = vpop.f32.mrb[4].mxu0  ;;  %v592_v19 = vmax.f32 %v514_v10, 0.0  ;;  %v517_v20 = vadd.f32 %v516_v16, %v2353_v57 }
  0xf0   : > { %v474_v17 = vadd.f32 %v2030_v13, %v2353_v57  ;;  %v465_v18 = vpop.f32.mrb[5].mxu0  ;;  %v595_v23 = vmax.f32 %v525_v15, 0.0 }
  0xf1   : > { %v466_v21 = vadd.f32 %v465_v18, %v2353_v57  ;;  %v2031_v22 = vpop.f32.mrb[6].mxu0  ;;  %2060 = vmatprep.mubr.msk.bf16.mxu1 %vm644_vm1, %v608_v12  ;;  %v593_v26 = vmax.f32 %v517_v20, 0.0 }
  0xf2   : > { %v477_v24 = vadd.f32 %v2031_v22, %v2353_v57  ;;  %v468_v25 = vpop.f32.mrb[7].mxu0  ;;  %2061 = vmatmul.mubr.msk.bf16.vlgmr.msra.gmra.mrb[16].mxu1 %vm644_vm1, %v609_v9  ;;  %v2369_v28 = vpack.c.bf16 %v595_v23, %v594_v14  ;;  %v582_v29 = vmax.f32 %v474_v17, 0.0 }
  0xf3   : > { %v469_v27 = vadd.f32 %v468_v25, %v2353_v57  ;;  %v2371_v31 = vpack.c.bf16 %v593_v26, %v592_v19  ;;  %v2046_v32 = vpop.f32.mrb[4].mxu1  ;;  %v580_v33 = vmax.f32 %v466_v21, 0.0 }
  0xf4   : > { %v583_v30 = vmax.f32 %v477_v24, 0.0  ;;  %v538_v35 = vadd.f32 %v2046_v32, %v2353_v57  ;;  %v529_v36 = vpop.f32.mrb[5].mxu1 }
  0xf5   : > { %v581_v34 = vmax.f32 %v469_v27, 0.0  ;;  %v530_v38 = vadd.f32 %v529_v36, %v2353_v57  ;;  %v2047_v39 = vpop.f32.mrb[6].mxu1 }
  0xf6   : > { %v611_v37 = vpack.c.bf16 %v583_v30, %v582_v29  ;;  %v598_v42 = vmax.f32 %v538_v35, 0.0  ;;  %v541_v43 = vadd.f32 %v2047_v39, %v2353_v57  ;;  %v532_v44 = vpop.f32.mrb[7].mxu1 }
  0xf7   : > { %v610_v40 = vpack.c.bf16 %v581_v34, %v580_v33  ;;  %v2034_v41 = vpop.f32.mrb[8].mxu0  ;;  %v596_v47 = vmax.f32 %v530_v38, 0.0  ;;  %v533_v48 = vadd.f32 %v532_v44, %v2353_v57 }
  0xf8   : > { %v490_v45 = vadd.f32 %v2034_v41, %v2353_v57  ;;  %v481_v46 = vpop.f32.mrb[9].mxu0  ;;  %v599_v51 = vmax.f32 %v541_v43, 0.0 }
  0xf9   : > { %v482_v49 = vadd.f32 %v481_v46, %v2353_v57  ;;  %v2035_v50 = vpop.f32.mrb[10].mxu0  ;;  %2064 = vmatprep.mubr.msk.bf16.mxu1 %vm644_vm1, %v610_v40  ;;  %v597_v55 = vmax.f32 %v533_v48, 0.0 }
  0xfa   : > { %v493_v52 = vadd.f32 %v2035_v50, %v2353_v57  ;;  %v484_v53 = vpop.f32.mrb[11].mxu0  ;;  %2065 = vmatmul.mubr.msk.bf16.gmra.mrb[20].mxu1 %vm644_vm1, %v611_v37  ;;  %v619_v59 = vpack.c.bf16 %v599_v51, %v598_v42  ;;  %v586_v60 = vmax.f32 %v490_v45, 0.0  ;;  %v2431_v50 = vld [vmem:[%s2413_s18 + $0x8] sm:$0xff] }
  0xfb   : > { %v485_v58 = vadd.f32 %v484_v53, %v2353_v57  ;;  %v618_v62 = vpack.c.bf16 %v597_v55, %v596_v47  ;;  %v2050_v63 = vpop.f32.mrb[8].mxu1  ;;  %v584_v0 = vmax.f32 %v482_v49, 0.0  ;;  %v1470_v51 = vmul.f32 %v2431_v50, %v2431_v50  ;;  %v2439_v53 = vld [vmem:[%s2413_s18 + $0x20] sm:$0xff] }
  0xfc   : > { %v587_v61 = vmax.f32 %v493_v52, 0.0  ;;  %v554_v2 = vadd.f32 %v2050_v63, %v2353_v57  ;;  %v545_v3 = vpop.f32.mrb[9].mxu1  ;;  %v2436_v52 = vld [vmem:[%s2413_s18 + $0x28] sm:$0xff]  ;;  %v2450_v63 = vld [vmem:[%s2413_s18 + $0x38] sm:$0xff] }
  0xfd   : > { %v585_v1 = vmax.f32 %v485_v58, 0.0  ;;  %v546_v5 = vadd.f32 %v545_v3, %v2353_v57  ;;  %v2051_v6 = vpop.f32.mrb[10].mxu1  ;;  %v1476_v3 = vmul.f32 %v2450_v63, %v2450_v63 }
  0xfe   : > { %v613_v4 = vpack.c.bf16 %v587_v61, %v586_v60  ;;  %v602_v9 = vmax.f32 %v554_v2, 0.0  ;;  %v557_v10 = vadd.f32 %v2051_v6, %v2353_v57  ;;  %v548_v11 = vpop.f32.mrb[11].mxu1  ;;  %v1505_v60 = vsel %vm1501_vm2, %v1470_v51, 0.0  ;;  %v2465_v6 = vld [vmem:[%s2413_s18 + $0x40] sm:$0xff]  ;;  %v1391_v51 = vld [vmem:[%s2413_s18 + $0xb0] sm:$0xff] }
  0xff   : > { %v612_v7 = vpack.c.bf16 %v585_v1, %v584_v0  ;;  %v2038_v8 = vpop.f32.mrb[12].mxu0  ;;  %v600_v14 = vmax.f32 %v546_v5, 0.0  ;;  %v549_v15 = vadd.f32 %v548_v11, %v2353_v57  ;;  %v1474_v61 = vmul.f32 %v2436_v52, %v2436_v52  ;;  %v2453_v0 = vld [vmem:[%s2413_s18 + $0x30] sm:$0xff]  ;;  %v2462_v5 = vld [vmem:[%s2413_s18 + $0x48] sm:$0xff]  ;;  %v2474_v11 = vld [vmem:[%s2413_s18 + $0x58] sm:$0xff] }
 0x100   : > { %v506_v12 = vadd.f32 %v2038_v8, %v2353_v57  ;;  %v497_v13 = vpop.f32.mrb[13].mxu0  ;;  %v603_v18 = vmax.f32 %v557_v10, 0.0  ;;  %v1477_v10 = vmul.f32 %v2465_v6, %v2465_v6 }
 0x101   : > { %v498_v16 = vadd.f32 %v497_v13, %v2353_v57  ;;  %v2039_v17 = vpop.f32.mrb[14].mxu0  ;;  %2068 = vmatprep.mubr.msk.bf16.mxu1 %vm644_vm1, %v612_v7  ;;  %v601_v21 = vmax.f32 %v549_v15, 0.0  ;;  %v1517_v1 = vsel %vm1501_vm2, %v1474_v61, 0.0  ;;  %v1523_v7 = vsel %vm1501_vm2, %v1476_v3, 0.0  ;;  %v1394_v61 = vld [vmem:[%s2413_s18 + $0xc8] sm:$0xff] }
 0x102   : > { %v509_v19 = vadd.f32 %v2039_v17, %v2353_v57  ;;  %v500_v20 = vpop.f32.mrb[15].mxu0  ;;  %2069 = vmatmul.mubr.msk.bf16.gmra.mrb[24].mxu1 %vm644_vm1, %v613_v4  ;;  %v621_v23 = vpack.c.bf16 %v603_v18, %v602_v9  ;;  %v590_v24 = vmax.f32 %v506_v12, 0.0  ;;  %v1475_v4 = vmul.f32 %v2453_v0, %v2453_v0  ;;  %v2477_v12 = vld [vmem:[%s2413_s18 + $0x50] sm:$0xff]  ;;  %v2486_v17 = vld [vmem:[%s2413_s18 + $0x68] sm:$0xff]  ;;  %v2489_v18 = vld [vmem:[%s2413_s18 + $0x60] sm:$0xff] }
 0x103   : > { %v501_v22 = vadd.f32 %v500_v20, %v2353_v57  ;;  %v620_v26 = vpack.c.bf16 %v601_v21, %v600_v14  ;;  %v2054_v27 = vpop.f32.mrb[12].mxu1  ;;  %v588_v29 = vmax.f32 %v498_v16, 0.0  ;;  %v1478_v9 = vmul.f32 %v2462_v5, %v2462_v5 }
 0x104   : > { %v591_v25 = vmax.f32 %v509_v19, 0.0  ;;  %v570_v32 = vadd.f32 %v2054_v27, %v2353_v57  ;;  %v561_v33 = vpop.f32.mrb[13].mxu1  ;;  %v1520_v8 = vsel %vm1501_vm2, %v1475_v4, 0.0  ;;  %v1526_v14 = vsel %vm1501_vm2, %v1477_v10, 0.0 }
 0x105   : > { %v589_v30 = vmax.f32 %v501_v22, 0.0  ;;  %v562_v35 = vadd.f32 %v561_v33, %v2353_v57  ;;  %v2055_v36 = vpop.f32.mrb[14].mxu1  ;;  %v1529_v13 = vsel %vm1501_vm2, %v1478_v9, 0.0  ;;  %v1480_v15 = vmul.f32 %v2474_v11, %v2474_v11 }
 0x106   : > { %v615_v34 = vpack.c.bf16 %v591_v25, %v590_v24  ;;  %v606_v38 = vmax.f32 %v570_v32, 0.0  ;;  %v573_v39 = vadd.f32 %v2055_v36, %v2353_v57  ;;  %v564_v40 = vpop.f32.mrb[15].mxu1  ;;  %v1479_v16 = vmul.f32 %v2477_v12, %v2477_v12  ;;  %v2501_v24 = vld [vmem:[%s2413_s18 + $0x70] sm:$0xff]  ;;  %v2513_v32 = vld [vmem:[%s2413_s18 + $0x80] sm:$0xff] }
 0x107   : > { %v614_v37 = vpack.c.bf16 %v589_v30, %v588_v29  ;;  %v604_v41 = vmax.f32 %v562_v35, 0.0  ;;  %v565_v42 = vadd.f32 %v564_v40, %v2353_v57  ;;  %v2416_v57 = vld [vmem:[%s2413_s18 + $0x10] sm:$0xff]  ;;  %v1535_v19 = vsel %vm1501_vm2, %v1480_v15, 0.0  ;;  %v2510_v30 = vld [vmem:[%s2413_s18 + $0x88] sm:$0xff] }
 0x108   : > { %v607_v43 = vmax.f32 %v573_v39, 0.0  ;;  %v1471_v47 = vmul.f32 %v2416_v57, %v2416_v57  ;;  %v1532_v20 = vsel %vm1501_vm2, %v1479_v16, 0.0  ;;  %v1482_v21 = vmul.f32 %v2486_v17, %v2486_v17  ;;  %v1398_v15 = vld [vmem:[%s2413_s18 + $0xe8] sm:$0xff]  ;;  %v1397_v16 = vld [vmem:[%s2413_s18 + $0xe0] sm:$0xff] }
 0x109   : > { %2072 = vmatprep.mubr.msk.bf16.mxu1 %vm644_vm1, %v614_v37  ;;  %v605_v44 = vmax.f32 %v565_v42, 0.0  ;;  %v1481_v22 = vmul.f32 %v2489_v18, %v2489_v18  ;;  %v1483_v29 = vmul.f32 %v2501_v24, %v2501_v24  ;;  %v1486_v35 = vmul.f32 %v2510_v30, %v2510_v30  ;;  %v2522_v37 = vld [vmem:[%s2413_s18 + $0x98] sm:$0xff] }
 0x10a   : > { %2073 = vmatmul.mubr.msk.bf16.gmra.mrb[28].mxu1 %vm644_vm1, %v615_v34  ;;  %v623_v45 = vpack.c.bf16 %v607_v43, %v606_v38  ;;  %v1508_v55 = vsel %vm1501_vm2, %v1471_v47, 0.0  ;;  %v1541_v25 = vsel %vm1501_vm2, %v1482_v21, 0.0  ;;  %v1485_v36 = vmul.f32 %v2513_v32, %v2513_v32  ;;  %v2525_v38 = vld [vmem:[%s2413_s18 + $0x90] sm:$0xff]  ;;  %v1390_v43 = vld [vmem:[%s2413_s18 + $0xa8] sm:$0xff] }
 0x10b   : > { %2076 = vmatprep.mubr.msk.bf16.mxu1 %vm644_vm1, %v2371_v31  ;;  %v622_v46 = vpack.c.bf16 %v605_v44, %v604_v41  ;;  %v2422_v31 = vld [vmem:[%s2413_s18 + $0x18] sm:$0xff]  ;;  %1509 = vadd.xlane.f32.xlu1 %v1508_v55  ;;  %v1544_v34 = vsel %vm1501_vm2, %v1483_v29, 0.0  ;;  %v1553_v39 = vsel %vm1501_vm2, %v1486_v35, 0.0  ;;  %v1488_v41 = vmul.f32 %v2522_v37, %v2522_v37  ;;  %v1389_v44 = vld [vmem:[%s2413_s18 + $0xa0] sm:$0xff] }
 0x10c   : > { %v1472_v49 = vmul.f32 %v2422_v31, %v2422_v31  ;;  %v1550_v40 = vsel %vm1501_vm2, %v1485_v36, 0.0  ;;  %v1487_v42 = vmul.f32 %v2525_v38, %v2525_v38  ;;  %v1490_v47 = vmul.f32 %v1390_v43, %v1390_v43 }
 0x10d   : > { %v1494_v3 = vmul.f32 %v1394_v61, %v1394_v61 }
 0x10e   : > { %v1565_v55 = vsel %vm1501_vm2, %v1490_v47, 0.0 }
 0x10f   : > { %v1577_v9 = vsel %vm1501_vm2, %v1494_v3, 0.0 }
 0x112   : > { %2077 = vmatmul.mubr.msk.bf16.gmra.mrb[32].mxu1 %vm644_vm1, %v2369_v28  ;;  %v2419_v28 = vld [vmem:[%s2413_s18] sm:$0xff] }
 0x113   : > { %2080 = vmatprep.mubr.msk.bf16.mxu1 %vm644_vm1, %v618_v62  ;;  %v1469_v48 = vmul.f32 %v2419_v28, %v2419_v28  ;;  %v1473_v62 = vmul.f32 %v2439_v53, %v2439_v53 }
 0x115   : > { %v1502_v58 = vsel %vm1501_vm2, %v1469_v48, 0.0  ;;  %v1514_v2 = vsel %vm1501_vm2, %v1473_v62, 0.0  ;;  %v1489_v48 = vmul.f32 %v1389_v44, %v1389_v44  ;;  %v1393_v62 = vld [vmem:[%s2413_s18 + $0xc0] sm:$0xff] }
 0x116   : > { %1503 = vadd.xlane.f32.xlu0 %v1502_v58  ;;  %v1493_v4 = vmul.f32 %v1393_v62, %v1393_v62 }
 0x117   : > { %v1562_v58 = vsel %vm1501_vm2, %v1489_v48, 0.0 }
 0x118   : > { %v1574_v10 = vsel %vm1501_vm2, %v1493_v4, 0.0 }
 0x11a   : > { %2081 = vmatmul.mubr.msk.bf16.gmra.mrb[36].mxu1 %vm644_vm1, %v619_v59  ;;  %v1511_v59 = vsel %vm1501_vm2, %v1472_v49, 0.0  ;;  %1506 = vadd.xlane.f32.xlu0 %v1505_v60  ;;  %v1392_v49 = vld [vmem:[%s2413_s18 + $0xb8] sm:$0xff]  ;;  %v1491_v60 = vmul.f32 %v1391_v51, %v1391_v51 }
 0x11b   : > { %2084 = vmatprep.mubr.msk.bf16.mxu1 %vm644_vm1, %v620_v26  ;;  %1512 = vadd.xlane.f32.xlu1 %v1511_v59  ;;  %v1538_v26 = vsel %vm1501_vm2, %v1481_v22, 0.0  ;;  %v1492_v59 = vmul.f32 %v1392_v49, %v1392_v49  ;;  %v1498_v22 = vmul.f32 %v1398_v15, %v1398_v15 }
 0x11e   : > { %1515 = vadd.xlane.f32.xlu0 %v1514_v2  ;;  %v1568_v2 = vsel %vm1501_vm2, %v1491_v60, 0.0 }
 0x11f   : > { %1518 = vadd.xlane.f32.xlu1 %v1517_v1  ;;  %v1571_v1 = vsel %vm1501_vm2, %v1492_v59, 0.0 }
 0x122   : > { %2085 = vmatmul.mubr.msk.bf16.gmra.mrb[40].mxu1 %vm644_vm1, %v621_v23  ;;  %1521 = vadd.xlane.f32.xlu0 %v1520_v8  ;;  %v2498_v23 = vld [vmem:[%s2413_s18 + $0x78] sm:$0xff]  ;;  %v1395_v8 = vld [vmem:[%s2413_s18 + $0xd0] sm:$0xff] }
 0x123   : > { %2088 = vmatprep.mubr.msk.bf16.mxu1 %vm644_vm1, %v622_v46  ;;  %1524 = vadd.xlane.f32.xlu1 %v1523_v7  ;;  %v1484_v27 = vmul.f32 %v2498_v23, %v2498_v23  ;;  %v1556_v46 = vsel %vm1501_vm2, %v1487_v42, 0.0  ;;  %v1396_v7 = vld [vmem:[%s2413_s18 + $0xd8] sm:$0xff] }
 0x125   : > { %v1547_v33 = vsel %vm1501_vm2, %v1484_v27, 0.0  ;;  %v1399_v27 = vld [vmem:[%s2413_s18 + $0xf0] sm:$0xff] }
 0x126   : > { %1527 = vadd.xlane.f32.xlu0 %v1526_v14  ;;  %v1495_v14 = vmul.f32 %v1395_v8, %v1395_v8  ;;  %v1499_v36 = vmul.f32 %v1399_v27, %v1399_v27 }
 0x127   : > { %1530 = vadd.xlane.f32.xlu1 %v1529_v13  ;;  %v1496_v13 = vmul.f32 %v1396_v7, %v1396_v7 }
 0x128   : > { %v1580_v21 = vsel %vm1501_vm2, %v1495_v14, 0.0  ;;  %v1592_v43 = vsel %vm1501_vm2, %v1499_v36, 0.0 }
 0x12a   : > { %2089 = vmatmul.mubr.msk.bf16.gmra.mrb[44].mxu1 %vm644_vm1, %v623_v45  ;;  %1533 = vadd.xlane.f32.xlu0 %v1532_v20  ;;  %v1559_v45 = vsel %vm1501_vm2, %v1488_v41, 0.0  ;;  %v1583_v20 = vsel %vm1501_vm2, %v1496_v13, 0.0 }
 0x12b   : > { %1536 = vadd.xlane.f32.xlu1 %v1535_v19  ;;  %v630_v19 = vsub.s32 1, %v2344_v54 }
 0x12d   : > { %v2557_v29 = vrot.slane %v2350_v56, %v630_v19 }
 0x12e   : > { %1539 = vadd.xlane.f32.xlu0 %v1538_v26  ;;  %v1400_v26 = vld [vmem:[%s2413_s18 + $0xf8] sm:$0xff] }
 0x12f   : > { %1542 = vadd.xlane.f32.xlu1 %v1541_v25  ;;  %v1497_v25 = vmul.f32 %v1397_v16, %v1397_v16  ;;  %v1500_v35 = vmul.f32 %v1400_v26, %v1400_v26 }
 0x131   : > { %v1595_v42 = vsel %vm1501_vm2, %v1500_v35, 0.0 }
 0x132   : > { %1545 = vadd.xlane.f32.xlu0 %v1544_v34  ;;  %v1586_v34 = vsel %vm1501_vm2, %v1497_v25, 0.0 }
 0x133   : > { %1548 = vadd.xlane.f32.xlu1 %v1547_v33  ;;  %v1589_v33 = vsel %vm1501_vm2, %v1498_v22, 0.0 }
 0x136   : > { %1551 = vadd.xlane.f32.xlu0 %v1550_v40 }
 0x137   : > { %1554 = vadd.xlane.f32.xlu1 %v1553_v39 }
 0x13a   : > { %1557 = vadd.xlane.f32.xlu0 %v1556_v46 }
 0x13b   : > { %1560 = vadd.xlane.f32.xlu1 %v1559_v45 }
 0x13e   : > { %1563 = vadd.xlane.f32.xlu0 %v1562_v58 }
 0x13f   : > { %1566 = vadd.xlane.f32.xlu1 %v1565_v55 }
 0x142   : > { %1569 = vadd.xlane.f32.xlu0 %v1568_v2 }
 0x143   : > { %1572 = vadd.xlane.f32.xlu1 %v1571_v1 }
 0x146   : > { %1575 = vadd.xlane.f32.xlu0 %v1574_v10 }
 0x147   : > { %1578 = vadd.xlane.f32.xlu1 %v1577_v9 }
 0x14a   : > { %1581 = vadd.xlane.f32.xlu0 %v1580_v21 }
 0x14b   : > { %1584 = vadd.xlane.f32.xlu1 %v1583_v20 }
 0x14e   : > { %1587 = vadd.xlane.f32.xlu0 %v1586_v34 }
 0x14f   : > { %1590 = vadd.xlane.f32.xlu1 %v1589_v33 }
 0x152   : > { %1593 = vadd.xlane.f32.xlu0 %v1592_v43 }
 0x153   : > { %1596 = vadd.xlane.f32.xlu1 %v1595_v42 }
 0x1c5   : > { %v2062_v39 = vpop.f32.mrb[16].mxu1 }
 0x1c6   : > { %v736_v40 = vadd.f32 %v2062_v39, %v2557_v29  ;;  %v727_v41 = vpop.f32.mrb[17].mxu1 }
 0x1c7   : > { %v728_v44 = vadd.f32 %v727_v41, %v2557_v29  ;;  %v2063_v45 = vpop.f32.mrb[18].mxu1 }
 0x1c8   : > { %v739_v46 = vadd.f32 %v2063_v45, %v2557_v29  ;;  %v730_v47 = vpop.f32.mrb[19].mxu1  ;;  %v856_v49 = vmax.f32 %v736_v40, 0.0 }
 0x1c9   : > { %v731_v48 = vadd.f32 %v730_v47, %v2557_v29  ;;  %v854_v55 = vmax.f32 %v728_v44, 0.0 }
 0x1ca   : > { %v857_v51 = vmax.f32 %v739_v46, 0.0 }
 0x1cb   : > { %v855_v58 = vmax.f32 %v731_v48, 0.0 }
 0x1cc   : > { %v887_v59 = vpack.c.bf16 %v857_v51, %v856_v49 }
 0x1cd   : > { %v886_v60 = vpack.c.bf16 %v855_v58, %v854_v55  ;;  %v2066_v61 = vpop.f32.mrb[20].mxu1 }
 0x1ce   : > { %v752_v62 = vadd.f32 %v2066_v61, %v2557_v29  ;;  %v743_v1 = vpop.f32.mrb[21].mxu1 }
 0x1cf   : > { %v744_v2 = vadd.f32 %v743_v1, %v2557_v29  ;;  %v2067_v3 = vpop.f32.mrb[22].mxu1  ;;  %2096 = vmatprep.mubr.msk.bf16.mxu0 %vm644_vm1, %v886_v60 }
 0x1d0   : > { %v755_v4 = vadd.f32 %v2067_v3, %v2557_v29  ;;  %v746_v7 = vpop.f32.mrb[23].mxu1  ;;  %2097 = vmatmul.mubr.msk.bf16.vlgmr.msra.gmra.mrb[16].mxu0 %vm644_vm1, %v887_v59  ;;  %v860_v9 = vmax.f32 %v752_v62, 0.0 }
 0x1d1   : > { %v747_v8 = vadd.f32 %v746_v7, %v2557_v29  ;;  %v858_v13 = vmax.f32 %v744_v2, 0.0 }
 0x1d2   : > { %v861_v10 = vmax.f32 %v755_v4, 0.0 }
 0x1d3   : > { %v859_v14 = vmax.f32 %v747_v8, 0.0 }
 0x1d4   : > { %v889_v15 = vpack.c.bf16 %v861_v10, %v860_v9 }
 0x1d5   : > { %v888_v16 = vpack.c.bf16 %v859_v14, %v858_v13  ;;  %v2070_v19 = vpop.f32.mrb[24].mxu1 }
 0x1d6   : > { %v768_v20 = vadd.f32 %v2070_v19, %v2557_v29  ;;  %v759_v21 = vpop.f32.mrb[25].mxu1 }
 0x1d7   : > { %v760_v22 = vadd.f32 %v759_v21, %v2557_v29  ;;  %v2071_v25 = vpop.f32.mrb[26].mxu1  ;;  %2100 = vmatprep.mubr.msk.bf16.mxu0 %vm644_vm1, %v888_v16 }
 0x1d8   : > { %v771_v26 = vadd.f32 %v2071_v25, %v2557_v29  ;;  %v762_v27 = vpop.f32.mrb[27].mxu1  ;;  %2101 = vmatmul.mubr.msk.bf16.gmra.mrb[20].mxu0 %vm644_vm1, %v889_v15  ;;  %v864_v34 = vmax.f32 %v768_v20, 0.0 }
 0x1d9   : > { %v763_v33 = vadd.f32 %v762_v27, %v2557_v29  ;;  %v862_v36 = vmax.f32 %v760_v22, 0.0 }
 0x1da   : > { %v865_v35 = vmax.f32 %v771_v26, 0.0 }
 0x1db   : > { %v863_v39 = vmax.f32 %v763_v33, 0.0 }
 0x1dc   : > { %v891_v40 = vpack.c.bf16 %v865_v35, %v864_v34 }
 0x1dd   : > { %v890_v41 = vpack.c.bf16 %v863_v39, %v862_v36  ;;  %v2074_v42 = vpop.f32.mrb[28].mxu1 }
 0x1de   : > { %v784_v43 = vadd.f32 %v2074_v42, %v2557_v29  ;;  %v775_v44 = vpop.f32.mrb[29].mxu1 }
 0x1df   : > { %v776_v45 = vadd.f32 %v775_v44, %v2557_v29  ;;  %v2075_v46 = vpop.f32.mrb[30].mxu1  ;;  %2104 = vmatprep.mubr.msk.bf16.mxu0 %vm644_vm1, %v890_v41 }
 0x1e0   : > { %v787_v47 = vadd.f32 %v2075_v46, %v2557_v29  ;;  %v778_v48 = vpop.f32.mrb[31].mxu1  ;;  %2105 = vmatmul.mubr.msk.bf16.gmra.mrb[24].mxu0 %vm644_vm1, %v891_v40  ;;  %v868_v51 = vmax.f32 %v784_v43, 0.0 }
 0x1e1   : > { %v779_v49 = vadd.f32 %v778_v48, %v2557_v29  ;;  %v866_v58 = vmax.f32 %v776_v45, 0.0 }
 0x1e2   : > { %v869_v55 = vmax.f32 %v787_v47, 0.0 }
 0x1e3   : > { %v867_v59 = vmax.f32 %v779_v49, 0.0 }
 0x1e4   : > { %v893_v60 = vpack.c.bf16 %v869_v55, %v868_v51 }
 0x1e5   : > { %v892_v61 = vpack.c.bf16 %v867_v59, %v866_v58  ;;  %v2078_v62 = vpop.f32.mrb[32].mxu1 }
 0x1e6   : > { %v800_v1 = vadd.f32 %v2078_v62, %v2557_v29  ;;  %v791_v2 = vpop.f32.mrb[33].mxu1 }
 0x1e7   : > { %v792_v3 = vadd.f32 %v791_v2, %v2557_v29  ;;  %v2079_v4 = vpop.f32.mrb[34].mxu1  ;;  %2108 = vmatprep.mubr.msk.bf16.mxu0 %vm644_vm1, %v892_v61 }
 0x1e8   : > { %v803_v7 = vadd.f32 %v2079_v4, %v2557_v29  ;;  %v794_v8 = vpop.f32.mrb[35].mxu1  ;;  %2109 = vmatmul.mubr.msk.bf16.gmra.mrb[28].mxu0 %vm644_vm1, %v893_v60  ;;  %v872_v10 = vmax.f32 %v800_v1, 0.0 }
 0x1e9   : > { %v795_v9 = vadd.f32 %v794_v8, %v2557_v29  ;;  %v870_v14 = vmax.f32 %v792_v3, 0.0 }
 0x1ea   : > { %v873_v13 = vmax.f32 %v803_v7, 0.0 }
 0x1eb   : > { %v871_v15 = vmax.f32 %v795_v9, 0.0 }
 0x1ec   : > { %v895_v16 = vpack.c.bf16 %v873_v13, %v872_v10 }
 0x1ed   : > { %v894_v19 = vpack.c.bf16 %v871_v15, %v870_v14  ;;  %v2082_v20 = vpop.f32.mrb[36].mxu1 }
 0x1ee   : > { %v816_v21 = vadd.f32 %v2082_v20, %v2557_v29  ;;  %v807_v22 = vpop.f32.mrb[37].mxu1 }
 0x1ef   : > { %v808_v25 = vadd.f32 %v807_v22, %v2557_v29  ;;  %v2083_v26 = vpop.f32.mrb[38].mxu1  ;;  %2112 = vmatprep.mubr.msk.bf16.mxu0 %vm644_vm1, %v894_v19  ;;  %v1510_v22 = vpop.xlane.xlu1 %1509 }
 0x1f0   : > { %v819_v27 = vadd.f32 %v2083_v26, %v2557_v29  ;;  %v810_v33 = vpop.f32.mrb[39].mxu1  ;;  %2113 = vmatmul.mubr.msk.bf16.gmra.mrb[32].mxu0 %vm644_vm1, %v895_v16  ;;  %v876_v35 = vmax.f32 %v816_v21, 0.0  ;;  %v1632_v21 = vsub.s32 6, %v2344_v54 }
 0x1f1   : > { %v811_v34 = vadd.f32 %v810_v33, %v2557_v29  ;;  %v874_v39 = vmax.f32 %v808_v25, 0.0  ;;  %v1504_v25 = vpop.xlane.xlu0 %1503 }
 0x1f2   : > { %v877_v36 = vmax.f32 %v819_v27, 0.0  ;;  %v2613_v26 = vrot.slane %v2350_v56, %v1632_v21  ;;  %v1600_v27 = vmul.f32 -0.5, %v1510_v22 }
 0x1f3   : > { %v875_v40 = vmax.f32 %v811_v34, 0.0 }
 0x1f4   : > { %v897_v41 = vpack.c.bf16 %v877_v36, %v876_v35  ;;  %v1636_v33 = vadd.f32 %v2613_v26, %v1600_v27  ;;  %v1513_v35 = vpop.xlane.xlu1 %1512 }
 0x1f5   : > { %v896_v42 = vpack.c.bf16 %v875_v40, %v874_v39  ;;  %v2086_v43 = vpop.f32.mrb[40].mxu1  ;;  %v1507_v36 = vpop.xlane.xlu0 %1506  ;;  %v1601_v56 = vmul.f32 -0.5, %v1513_v35 }
 0x1f6   : > { %v832_v44 = vadd.f32 %v2086_v43, %v2557_v29  ;;  %v823_v45 = vpop.f32.mrb[41].mxu1  ;;  %1733 = vst.msk [vmem:[%s2621_s22 + $0x10] sm:$0xff] %vm1730_vm3, %v1636_v33  ;;  %v1599_v39 = vmul.f32 -0.5, %v1507_v36 }
 0x1f7   : > { %v824_v46 = vadd.f32 %v823_v45, %v2557_v29  ;;  %v2087_v47 = vpop.f32.mrb[42].mxu1  ;;  %2116 = vmatprep.mubr.msk.bf16.mxu0 %vm644_vm1, %v896_v42  ;;  %v1637_v40 = vadd.f32 %v2613_v26, %v1601_v56 }
 0x1f8   : > { %v835_v48 = vadd.f32 %v2087_v47, %v2557_v29  ;;  %v826_v49 = vpop.f32.mrb[43].mxu1  ;;  %2117 = vmatmul.mubr.msk.bf16.gmra.mrb[36].mxu0 %vm644_vm1, %v897_v41  ;;  %v880_v55 = vmax.f32 %v832_v44, 0.0  ;;  %v1635_v41 = vadd.f32 %v2613_v26, %v1599_v39  ;;  %v1519_v42 = vpop.xlane.xlu1 %1518 }
 0x1f9   : > { %v827_v51 = vadd.f32 %v826_v49, %v2557_v29  ;;  %v878_v59 = vmax.f32 %v824_v46, 0.0  ;;  %1734 = vst.msk [vmem:[%s2621_s22 + $0x18] sm:$0xff] %vm1730_vm3, %v1637_v40  ;;  %v1516_v43 = vpop.xlane.xlu0 %1515  ;;  %v1603_v44 = vmul.f32 -0.5, %v1519_v42 }
 0x1fa   : > { %v881_v58 = vmax.f32 %v835_v48, 0.0  ;;  %1732 = vst.msk [vmem:[%s2621_s22 + $0x8] sm:$0xff] %vm1730_vm3, %v1635_v41  ;;  %v1602_v45 = vmul.f32 -0.5, %v1516_v43 }
 0x1fb   : > { %v879_v60 = vmax.f32 %v827_v51, 0.0  ;;  %v1639_v46 = vadd.f32 %v2613_v26, %v1603_v44 }
 0x1fc   : > { %v899_v61 = vpack.c.bf16 %v881_v58, %v880_v55  ;;  %v1638_v47 = vadd.f32 %v2613_v26, %v1602_v45  ;;  %v1525_v48 = vpop.xlane.xlu1 %1524 }
 0x1fd   : > { %v898_v62 = vpack.c.bf16 %v879_v60, %v878_v59  ;;  %v2090_v1 = vpop.f32.mrb[44].mxu1  ;;  %v1522_v49 = vpop.xlane.xlu0 %1521  ;;  %1736 = vst.msk [vmem:[%s2621_s22 + $0x28] sm:$0xff] %vm1730_vm3, %v1639_v46  ;;  %v1605_v51 = vmul.f32 -0.5, %v1525_v48 }
 0x1fe   : > { %v848_v2 = vadd.f32 %v2090_v1, %v2557_v29  ;;  %v839_v3 = vpop.f32.mrb[45].mxu1  ;;  %1735 = vst.msk [vmem:[%s2621_s22 + $0x20] sm:$0xff] %vm1730_vm3, %v1638_v47  ;;  %v1604_v55 = vmul.f32 -0.5, %v1522_v49 }
 0x1ff   : > { %v840_v4 = vadd.f32 %v839_v3, %v2557_v29  ;;  %v2091_v7 = vpop.f32.mrb[46].mxu1  ;;  %2120 = vmatprep.mubr.msk.bf16.mxu0 %vm644_vm1, %v898_v62  ;;  %v1641_v58 = vadd.f32 %v2613_v26, %v1605_v51 }
 0x200   : > { %v851_v8 = vadd.f32 %v2091_v7, %v2557_v29  ;;  %v842_v9 = vpop.f32.mrb[47].mxu1  ;;  %2121 = vmatmul.mubr.msk.bf16.gmra.mrb[40].mxu0 %vm644_vm1, %v899_v61  ;;  %v884_v13 = vmax.f32 %v848_v2, 0.0  ;;  %v1640_v59 = vadd.f32 %v2613_v26, %v1604_v55  ;;  %v1531_v60 = vpop.xlane.xlu1 %1530 }
 0x201   : > { %v843_v10 = vadd.f32 %v842_v9, %v2557_v29  ;;  %v882_v15 = vmax.f32 %v840_v4, 0.0  ;;  %v1598_v29 = vmul.f32 -0.5, %v1504_v25  ;;  %v1528_v61 = vpop.xlane.xlu0 %1527  ;;  %1738 = vst.msk [vmem:[%s2621_s22 + $0x38] sm:$0xff] %vm1730_vm3, %v1641_v58  ;;  %v1607_v62 = vmul.f32 -0.5, %v1531_v60 }
 0x202   : > { %v885_v14 = vmax.f32 %v851_v8, 0.0  ;;  %1737 = vst.msk [vmem:[%s2621_s22 + $0x30] sm:$0xff] %vm1730_vm3, %v1640_v59  ;;  %v1606_v1 = vmul.f32 -0.5, %v1528_v61 }
 0x203   : > { %v883_v16 = vmax.f32 %v843_v10, 0.0  ;;  %v1634_v34 = vadd.f32 %v2613_v26, %v1598_v29  ;;  %v1643_v2 = vadd.f32 %v2613_v26, %v1607_v62 }
 0x204   : > { %v901_v19 = vpack.c.bf16 %v885_v14, %v884_v13  ;;  %v1642_v3 = vadd.f32 %v2613_v26, %v1606_v1  ;;  %v1537_v4 = vpop.xlane.xlu1 %1536 }
 0x205   : > { %v900_v20 = vpack.c.bf16 %v883_v16, %v882_v15  ;;  %1731 = vst.msk [vmem:[%s2621_s22] sm:$0xff] %vm1730_vm3, %v1634_v34  ;;  %v1534_v7 = vpop.xlane.xlu0 %1533  ;;  %1740 = vst.msk [vmem:[%s2621_s22 + $0x48] sm:$0xff] %vm1730_vm3, %v1643_v2  ;;  %v1609_v8 = vmul.f32 -0.5, %v1537_v4 }
 0x206   : > { %1739 = vst.msk [vmem:[%s2621_s22 + $0x40] sm:$0xff] %vm1730_vm3, %v1642_v3  ;;  %v1608_v9 = vmul.f32 -0.5, %v1534_v7 }
 0x207   : > { %2124 = vmatprep.mubr.msk.bf16.mxu0 %vm644_vm1, %v900_v20  ;;  %v1645_v10 = vadd.f32 %v2613_v26, %v1609_v8 }
 0x208   : > { %2125 = vmatmul.mubr.msk.bf16.gmra.mrb[44].mxu0 %vm644_vm1, %v901_v19  ;;  %v1644_v13 = vadd.f32 %v2613_v26, %v1608_v9  ;;  %v1543_v14 = vpop.xlane.xlu1 %1542 }
 0x209   : > { %v1540_v15 = vpop.xlane.xlu0 %1539  ;;  %1742 = vst.msk [vmem:[%s2621_s22 + $0x58] sm:$0xff] %vm1730_vm3, %v1645_v10  ;;  %v1611_v16 = vmul.f32 -0.5, %v1543_v14 }
 0x20a   : > { %1741 = vst.msk [vmem:[%s2621_s22 + $0x50] sm:$0xff] %vm1730_vm3, %v1644_v13  ;;  %v1610_v19 = vmul.f32 -0.5, %v1540_v15 }
 0x20b   : > { %v1647_v20 = vadd.f32 %v2613_v26, %v1611_v16 }
 0x20c   : > { %v1646_v21 = vadd.f32 %v2613_v26, %v1610_v19  ;;  %v1549_v22 = vpop.xlane.xlu1 %1548 }
 0x20d   : > { %v1546_v25 = vpop.xlane.xlu0 %1545  ;;  %1744 = vst.msk [vmem:[%s2621_s22 + $0x68] sm:$0xff] %vm1730_vm3, %v1647_v20  ;;  %v1613_v27 = vmul.f32 -0.5, %v1549_v22 }
 0x20e   : > { %1743 = vst.msk [vmem:[%s2621_s22 + $0x60] sm:$0xff] %vm1730_vm3, %v1646_v21  ;;  %v1612_v29 = vmul.f32 -0.5, %v1546_v25 }
 0x20f   : > { %v1649_v33 = vadd.f32 %v2613_v26, %v1613_v27 }
 0x210   : > { %v1648_v34 = vadd.f32 %v2613_v26, %v1612_v29  ;;  %v1555_v35 = vpop.xlane.xlu1 %1554 }
 0x211   : > { %1746 = vst.msk [vmem:[%s2621_s22 + $0x78] sm:$0xff] %vm1730_vm3, %v1649_v33  ;;  %v1552_v36 = vpop.xlane.xlu0 %1551  ;;  %v1615_v56 = vmul.f32 -0.5, %v1555_v35 }
 0x212   : > { %1745 = vst.msk [vmem:[%s2621_s22 + $0x70] sm:$0xff] %vm1730_vm3, %v1648_v34  ;;  %v1614_v39 = vmul.f32 -0.5, %v1552_v36 }
 0x213   : > { %v1651_v40 = vadd.f32 %v2613_v26, %v1615_v56 }
 0x214   : > { %v1650_v41 = vadd.f32 %v2613_v26, %v1614_v39  ;;  %v1561_v42 = vpop.xlane.xlu1 %1560 }
 0x215   : > { %v1558_v43 = vpop.xlane.xlu0 %1557  ;;  %1748 = vst.msk [vmem:[%s2621_s22 + $0x88] sm:$0xff] %vm1730_vm3, %v1651_v40  ;;  %v1617_v44 = vmul.f32 -0.5, %v1561_v42  ;;  %v2720_v42 = vld [vmem:[%s3111_s3] sm:$0xff] }
 0x216   : > { %1747 = vst.msk [vmem:[%s2621_s22 + $0x80] sm:$0xff] %vm1730_vm3, %v1650_v41  ;;  %v1616_v45 = vmul.f32 -0.5, %v1558_v43  ;;  %v1367_v43 = vmul.f32 1.442695, %v2720_v42 }
 0x217   : > { %v1653_v46 = vadd.f32 %v2613_v26, %v1617_v44  ;;  %v1129_v44 = vsub.s32 2, %v2344_v54 }
 0x218   : > { %v1652_v47 = vadd.f32 %v2613_v26, %v1616_v45  ;;  %v1567_v48 = vpop.xlane.xlu1 %1566  ;;  %2143 = vpow2.f32 %v1367_v43 }
 0x219   : > { %v1564_v49 = vpop.xlane.xlu0 %1563  ;;  %1750 = vst.msk [vmem:[%s2621_s22 + $0x98] sm:$0xff] %vm1730_vm3, %v1653_v46  ;;  %v1619_v51 = vmul.f32 -0.5, %v1567_v48  ;;  %v2725_v45 = vrot.slane %v2720_v42, %v1129_v44  ;;  %v1403_v46 = vsub.s32 3, %v2344_v54 }
 0x21a   : > { %1749 = vst.msk [vmem:[%s2621_s22 + $0x90] sm:$0xff] %vm1730_vm3, %v1652_v47  ;;  %v1618_v55 = vmul.f32 -0.5, %v1564_v49 }
 0x21b   : > { %v1655_v58 = vadd.f32 %v2613_v26, %v1619_v51 }
 0x21c   : > { %v1654_v59 = vadd.f32 %v2613_v26, %v1618_v55  ;;  %v1573_v60 = vpop.xlane.xlu1 %1572 }
 0x21d   : > { %v1570_v61 = vpop.xlane.xlu0 %1569  ;;  %1752 = vst.msk [vmem:[%s2621_s22 + $0xa8] sm:$0xff] %vm1730_vm3, %v1655_v58  ;;  %v1621_v62 = vmul.f32 -0.5, %v1573_v60 }
 0x21e   : > { %1751 = vst.msk [vmem:[%s2621_s22 + $0xa0] sm:$0xff] %vm1730_vm3, %v1654_v59  ;;  %v1620_v1 = vmul.f32 -0.5, %v1570_v61 }
 0x21f   : > { %v1657_v2 = vadd.f32 %v2613_v26, %v1621_v62 }
 0x220   : > { %v1656_v3 = vadd.f32 %v2613_v26, %v1620_v1  ;;  %v1579_v4 = vpop.xlane.xlu1 %1578 }
 0x221   : > { %v1576_v7 = vpop.xlane.xlu0 %1575  ;;  %1754 = vst.msk [vmem:[%s2621_s22 + $0xb8] sm:$0xff] %vm1730_vm3, %v1657_v2  ;;  %v1623_v8 = vmul.f32 -0.5, %v1579_v4 }
 0x222   : > { %1753 = vst.msk [vmem:[%s2621_s22 + $0xb0] sm:$0xff] %vm1730_vm3, %v1656_v3  ;;  %v1622_v9 = vmul.f32 -0.5, %v1576_v7  ;;  %v2144_v47 = vpop.eup %2143  ;;  %v1164_v7 = vrot.slane %v2720_v42, 7 }
 0x223   : > { %v1659_v10 = vadd.f32 %v2613_v26, %v1623_v8  ;;  %v2731_v61 = vrot.slane %v2144_v47, %v1403_v46 }
 0x224   : > { %v1658_v13 = vadd.f32 %v2613_v26, %v1622_v9  ;;  %v1585_v14 = vpop.xlane.xlu1 %1584 }
 0x225   : > { %v1582_v15 = vpop.xlane.xlu0 %1581  ;;  %1756 = vst.msk [vmem:[%s2621_s22 + $0xc8] sm:$0xff] %vm1730_vm3, %v1659_v10  ;;  %v1625_v16 = vmul.f32 -0.5, %v1585_v14  ;;  %v2736_v4 = vmul.f32 %v2731_v61, %v2416_v57  ;;  %v2741_v9 = vmul.f32 %v2731_v61, %v2419_v28  ;;  %v2745_v10 = vmul.f32 %v2731_v61, %v2422_v31 }
 0x226   : > { %1755 = vst.msk [vmem:[%s2621_s22 + $0xc0] sm:$0xff] %vm1730_vm3, %v1658_v13  ;;  %v1624_v19 = vmul.f32 -0.5, %v1582_v15  ;;  %v2749_v13 = vmul.f32 %v2731_v61, %v2431_v50  ;;  %v2754_v15 = vmul.f32 %v2731_v61, %v2436_v52  ;;  %v2762_v28 = vmul.f32 %v2731_v61, %v2450_v63 }
 0x227   : > { %v1661_v20 = vadd.f32 %v2613_v26, %v1625_v16  ;;  %v2758_v16 = vmul.f32 %v2731_v61, %v2439_v53  ;;  %v2767_v50 = vmul.f32 %v2731_v61, %v2453_v0  ;;  %v1297_v63 = vsub.s32 5, %v2344_v54 }
 0x228   : > { %v1660_v21 = vadd.f32 %v2613_v26, %v1624_v19  ;;  %v1591_v22 = vpop.xlane.xlu1 %1590  ;;  %v2783_v0 = vmul.f32 %v2731_v61, %v2474_v11  ;;  %v2800_v11 = vmul.f32 %v2731_v61, %v2498_v23  ;;  %v2814_v23 = vmul.f32 %v2731_v61, %v2513_v32 }
 0x229   : > { %v1588_v25 = vpop.xlane.xlu0 %1587  ;;  %1758 = vst.msk [vmem:[%s2621_s22 + $0xd8] sm:$0xff] %vm1730_vm3, %v1661_v20  ;;  %v1627_v27 = vmul.f32 -0.5, %v1591_v22  ;;  %v2771_v20 = vmul.f32 %v2731_v61, %v2462_v5  ;;  %v1166_v22 = vsub.f32 %v2720_v42, %v1164_v7 }
 0x22a   : > { %1757 = vst.msk [vmem:[%s2621_s22 + $0xd0] sm:$0xff] %vm1730_vm3, %v1660_v21  ;;  %v1626_v29 = vmul.f32 -0.5, %v1588_v25 }
 0x22b   : > { %v1663_v33 = vadd.f32 %v2613_v26, %v1627_v27 }
 0x22c   : > { %v1662_v34 = vadd.f32 %v2613_v26, %v1626_v29  ;;  %v1597_v35 = vpop.xlane.xlu1 %1596  ;;  %v2779_v29 = vmul.f32 %v2731_v61, %v2465_v6  ;;  %v2796_v6 = vmul.f32 %v2731_v61, %v2489_v18  ;;  %v2810_v18 = vmul.f32 %v2731_v61, %v2510_v30 }
 0x22d   : > { %v1594_v36 = vpop.xlane.xlu0 %1593  ;;  %1760 = vst.msk [vmem:[%s2621_s22 + $0xe8] sm:$0xff] %vm1730_vm3, %v1663_v33  ;;  %v1629_v56 = vmul.f32 -0.5, %v1597_v35  ;;  %v2787_v33 = vmul.f32 %v2731_v61, %v2477_v12 }
 0x22e   : > { %1759 = vst.msk [vmem:[%s2621_s22 + $0xe0] sm:$0xff] %vm1730_vm3, %v1662_v34  ;;  %v1628_v39 = vmul.f32 -0.5, %v1594_v36  ;;  %v1333_v34 = vsub.s32 4, %v2344_v54  ;;  %v2804_v54 = vmul.f32 %v2731_v61, %v2501_v24 }
 0x22f   : > { %v1665_v40 = vadd.f32 %v2613_v26, %v1629_v56  ;;  %v2792_v56 = vmul.f32 %v2731_v61, %v2486_v17 }
 0x230   : > { %v1664_v41 = vadd.f32 %v2613_v26, %v1628_v39  ;;  %v2818_v47 = vrot.slane %v2720_v42, %v1333_v34 }
 0x231   : > { %1762 = vst.msk [vmem:[%s2621_s22 + $0xf8] sm:$0xff] %vm1730_vm3, %v1665_v40  ;;  %v2806_v40 = vrot.slane %v1166_v22, %v1297_v63 }
 0x232   : > { %1761 = vst.msk [vmem:[%s2621_s22 + $0xf0] sm:$0xff] %vm1730_vm3, %v1664_v41 }
 0x2a3   : > { %v2098_v26 = vpop.f32.mrb[16].mxu0 }
 0x2a4   : > { %v1133_v48 = vadd.f32 %v2098_v26, %v2725_v45  ;;  %v1000_v49 = vpop.f32.mrb[17].mxu0 }
 0x2a5   : > { %v1131_v51 = vadd.f32 %v2725_v45, %v1000_v49  ;;  %v2099_v55 = vpop.f32.mrb[18].mxu0 }
 0x2a6   : > { %v1169_v58 = vmul.f32 0.5, %v1133_v48  ;;  %v1134_v59 = vadd.f32 %v2099_v55, %v2725_v45  ;;  %v1003_v60 = vpop.f32.mrb[19].mxu0 }
 0x2a7   : > { %v1167_v62 = vmul.f32 0.5, %v1131_v51  ;;  %v1132_v1 = vadd.f32 %v2725_v45, %v1003_v60 }
 0x2a8   : > { %2145 = vtanh.f32 %v1169_v58  ;;  %v1170_v2 = vmul.f32 0.5, %v1134_v59 }
 0x2a9   : > { %2147 = vtanh.f32 %v1167_v62  ;;  %v1168_v3 = vmul.f32 0.5, %v1132_v1 }
 0x2aa   : > { %2149 = vtanh.f32 %v1170_v2 }
 0x2ab   : > { %2151 = vtanh.f32 %v1168_v3  ;;  %v2102_v8 = vpop.f32.mrb[20].mxu0 }
 0x2ac   : > { %v1137_v14 = vadd.f32 %v2102_v8, %v2725_v45  ;;  %v1016_v57 = vpop.f32.mrb[21].mxu0 }
 0x2ad   : > { %v1135_v31 = vadd.f32 %v2725_v45, %v1016_v57  ;;  %v2103_v19 = vpop.f32.mrb[22].mxu0 }
 0x2ae   : > { %v1173_v52 = vmul.f32 0.5, %v1137_v14  ;;  %v1138_v21 = vadd.f32 %v2103_v19, %v2725_v45  ;;  %v1019_v53 = vpop.f32.mrb[23].mxu0  ;;  %v2835_v19 = vmul.f32 %v2731_v61, %v2522_v37 }
 0x2af   : > { %v1171_v25 = vmul.f32 0.5, %v1135_v31  ;;  %v1136_v27 = vadd.f32 %v2725_v45, %v1019_v53 }
 0x2b0   : > { %2153 = vtanh.f32 %v1173_v52  ;;  %v1174_v5 = vmul.f32 0.5, %v1138_v21 }
 0x2b1   : > { %2155 = vtanh.f32 %v1171_v25  ;;  %v1172_v35 = vmul.f32 0.5, %v1136_v27 }
 0x2b2   : > { %v2146_v36 = vpop.eup %2145  ;;  %2157 = vtanh.f32 %v1174_v5 }
 0x2b3   : > { %v2148_v12 = vpop.eup %2147  ;;  %v1233_v39 = vadd.f32 1.0, %v2146_v36  ;;  %2159 = vtanh.f32 %v1172_v35  ;;  %v2106_v17 = vpop.f32.mrb[24].mxu0 }
 0x2b4   : > { %v2150_v41 = vpop.eup %2149  ;;  %v1231_v43 = vadd.f32 1.0, %v2148_v12  ;;  %v1141_v44 = vadd.f32 %v2106_v17, %v2725_v45  ;;  %v1032_v46 = vpop.f32.mrb[25].mxu0 }
 0x2b5   : > { %v2152_v24 = vpop.eup %2151  ;;  %v1265_v26 = vmul.f32 0.5, %v1233_v39  ;;  %v1234_v48 = vadd.f32 1.0, %v2150_v41  ;;  %v1139_v49 = vadd.f32 %v2725_v45, %v1032_v46  ;;  %v2107_v51 = vpop.f32.mrb[26].mxu0 }
 0x2b6   : > { %v1263_v30 = vmul.f32 0.5, %v1231_v43  ;;  %v1232_v55 = vadd.f32 1.0, %v2152_v24  ;;  %v1177_v58 = vmul.f32 0.5, %v1141_v44  ;;  %v1142_v32 = vadd.f32 %v2107_v51, %v2725_v45  ;;  %v1035_v59 = vpop.f32.mrb[27].mxu0 }
 0x2b7   : > { %v1301_v60 = vmul.f32 %v2806_v40, %v1265_v26  ;;  %v1266_v62 = vmul.f32 0.5, %v1234_v48  ;;  %v1175_v1 = vmul.f32 0.5, %v1139_v49  ;;  %v1140_v2 = vadd.f32 %v2725_v45, %v1035_v59 }
 0x2b8   : > { %v1299_v42 = vmul.f32 %v2806_v40, %v1263_v30  ;;  %v1264_v3 = vmul.f32 0.5, %v1232_v55  ;;  %2161 = vtanh.f32 %v1177_v58  ;;  %v1178_v7 = vmul.f32 0.5, %v1142_v32 }
 0x2b9   : > { %v1337_v8 = vadd.f32 %v2818_v47, %v1301_v60  ;;  %v1302_v14 = vmul.f32 %v2806_v40, %v1266_v62  ;;  %2163 = vtanh.f32 %v1175_v1  ;;  %v1176_v57 = vmul.f32 0.5, %v1140_v2 }
 0x2ba   : > { %v2154_v31 = vpop.eup %2153  ;;  %v1335_v52 = vadd.f32 %v2818_v47, %v1299_v42  ;;  %v1300_v21 = vmul.f32 %v2806_v40, %v1264_v3  ;;  %2165 = vtanh.f32 %v1178_v7  ;;  %v2877_v1 = vmul.f32 %v2731_v61, %v2525_v38 }
 0x2bb   : > { %v2156_v53 = vpop.eup %2155  ;;  %v1439_v22 = vadd.f32 %v2736_v4, %v1337_v8  ;;  %1668 = vst.msk [vmem:[%s2828_s27 + $0x10] sm:$0xff] %vm1501_vm2, %v1337_v8  ;;  %v1338_v37 = vadd.f32 %v2818_v47, %v1302_v14  ;;  %v1237_v63 = vadd.f32 1.0, %v2154_v31  ;;  %2167 = vtanh.f32 %v1176_v57  ;;  %v2110_v25 = vpop.f32.mrb[28].mxu0 }
 0x2bc   : > { %v2158_v27 = vpop.eup %2157  ;;  %v1437_v5 = vadd.f32 %v2741_v9, %v1335_v52  ;;  %1666 = vst.msk [vmem:[%s2828_s27] sm:$0xff] %vm1501_vm2, %v1335_v52  ;;  %v1336_v34 = vadd.f32 %v2818_v47, %v1300_v21  ;;  %v1235_v35 = vadd.f32 1.0, %v2156_v53  ;;  %v1145_v4 = vadd.f32 %v2110_v25, %v2725_v45  ;;  %v1048_v36 = vpop.f32.mrb[29].mxu0 }
 0x2bd   : > { %v2160_v12 = vpop.eup %2159  ;;  %1700 = vst.msk [vmem:[%s2841_s7 + $0x10] sm:$0xff] %vm1501_vm2, %v1439_v22  ;;  %v1440_v39 = vadd.f32 %v2745_v10, %v1338_v37  ;;  %1669 = vst.msk [vmem:[%s2828_s27 + $0x18] sm:$0xff] %vm1501_vm2, %v1338_v37  ;;  %v1269_v17 = vmul.f32 0.5, %v1237_v63  ;;  %v1238_v9 = vadd.f32 1.0, %v2158_v27  ;;  %v1143_v41 = vadd.f32 %v2725_v45, %v1048_v36  ;;  %v2111_v43 = vpop.f32.mrb[30].mxu0 }
 0x2be   : > { %1698 = vst.msk [vmem:[%s2841_s7] sm:$0xff] %vm1501_vm2, %v1437_v5  ;;  %v1438_v44 = vadd.f32 %v2749_v13, %v1336_v34  ;;  %1667 = vst.msk [vmem:[%s2828_s27 + $0x8] sm:$0xff] %vm1501_vm2, %v1336_v34  ;;  %v1267_v46 = vmul.f32 0.5, %v1235_v35  ;;  %v1236_v24 = vadd.f32 1.0, %v2160_v12  ;;  %v1181_v26 = vmul.f32 0.5, %v1145_v4  ;;  %v1051_v48 = vpop.f32.mrb[31].mxu0 }
 0x2bf   : > { %1701 = vst.msk [vmem:[%s2841_s7 + $0x18] sm:$0xff] %vm1501_vm2, %v1440_v39  ;;  %v1305_v10 = vmul.f32 %v2806_v40, %v1269_v17  ;;  %v1270_v49 = vmul.f32 0.5, %v1238_v9  ;;  %v1179_v51 = vmul.f32 0.5, %v1143_v41  ;;  %v1146_v30 = vadd.f32 %v2111_v43, %v2725_v45 }
 0x2c0   : > { %1699 = vst.msk [vmem:[%s2841_s7 + $0x8] sm:$0xff] %vm1501_vm2, %v1438_v44  ;;  %v1303_v55 = vmul.f32 %v2806_v40, %v1267_v46  ;;  %v1268_v13 = vmul.f32 0.5, %v1236_v24  ;;  %2169 = vtanh.f32 %v1181_v26  ;;  %v1144_v58 = vadd.f32 %v2725_v45, %v1051_v48 }
 0x2c1   : > { %v1341_v32 = vadd.f32 %v2818_v47, %v1305_v10  ;;  %v1306_v59 = vmul.f32 %v2806_v40, %v1270_v49  ;;  %2171 = vtanh.f32 %v1179_v51  ;;  %v1182_v60 = vmul.f32 0.5, %v1146_v30 }
 0x2c2   : > { %v2162_v62 = vpop.eup %2161  ;;  %v1339_v2 = vadd.f32 %v2818_v47, %v1303_v55  ;;  %v1304_v42 = vmul.f32 %v2806_v40, %v1268_v13  ;;  %v1180_v3 = vmul.f32 0.5, %v1144_v58 }
 0x2c3   : > { %v2164_v7 = vpop.eup %2163  ;;  %v1443_v8 = vadd.f32 %v2767_v50, %v1341_v32  ;;  %1672 = vst.msk [vmem:[%s2828_s27 + $0x30] sm:$0xff] %vm1501_vm2, %v1341_v32  ;;  %v1342_v14 = vadd.f32 %v2818_v47, %v1306_v59  ;;  %v1241_v57 = vadd.f32 1.0, %v2162_v62  ;;  %2173 = vtanh.f32 %v1182_v60  ;;  %v2114_v31 = vpop.f32.mrb[32].mxu0 }
 0x2c4   : > { %v2166_v38 = vpop.eup %2165  ;;  %v1441_v52 = vadd.f32 %v2758_v16, %v1339_v2  ;;  %1670 = vst.msk [vmem:[%s2828_s27 + $0x20] sm:$0xff] %vm1501_vm2, %v1339_v2  ;;  %v1340_v21 = vadd.f32 %v2818_v47, %v1304_v42  ;;  %v1239_v53 = vadd.f32 1.0, %v2164_v7  ;;  %2175 = vtanh.f32 %v1180_v3  ;;  %v1064_v50 = vpop.f32.mrb[33].mxu0 }
 0x2c5   : > { %v2168_v22 = vpop.eup %2167  ;;  %1704 = vst.msk [vmem:[%s2841_s7 + $0x30] sm:$0xff] %vm1501_vm2, %v1443_v8  ;;  %v1444_v37 = vadd.f32 %v2762_v28, %v1342_v14  ;;  %1673 = vst.msk [vmem:[%s2828_s27 + $0x38] sm:$0xff] %vm1501_vm2, %v1342_v14  ;;  %v1273_v63 = vmul.f32 0.5, %v1241_v57  ;;  %v1242_v25 = vadd.f32 1.0, %v2166_v38  ;;  %v1149_v16 = vadd.f32 %v2114_v31, %v2725_v45  ;;  %v2115_v27 = vpop.f32.mrb[34].mxu0 }
 0x2c6   : > { %1702 = vst.msk [vmem:[%s2841_s7 + $0x20] sm:$0xff] %vm1501_vm2, %v1441_v52  ;;  %v1442_v5 = vadd.f32 %v2754_v15, %v1340_v21  ;;  %1671 = vst.msk [vmem:[%s2828_s27 + $0x28] sm:$0xff] %vm1501_vm2, %v1340_v21  ;;  %v1271_v34 = vmul.f32 0.5, %v1239_v53  ;;  %v1240_v35 = vadd.f32 1.0, %v2168_v22  ;;  %v1147_v4 = vadd.f32 %v2725_v45, %v1064_v50  ;;  %v1067_v36 = vpop.f32.mrb[35].mxu0 }
 0x2c7   : > { %1705 = vst.msk [vmem:[%s2841_s7 + $0x38] sm:$0xff] %vm1501_vm2, %v1444_v37  ;;  %v1309_v28 = vmul.f32 %v2806_v40, %v1273_v63  ;;  %v1274_v12 = vmul.f32 0.5, %v1242_v25  ;;  %v1185_v39 = vmul.f32 0.5, %v1149_v16  ;;  %v1150_v17 = vadd.f32 %v2115_v27, %v2725_v45  ;;  %v2210_v25 = vld [vmem:[%s2413_s18 + $0xa8] sm:$0xff] }
 0x2c8   : > { %1703 = vst.msk [vmem:[%s2841_s7 + $0x28] sm:$0xff] %vm1501_vm2, %v1442_v5  ;;  %v1307_v15 = vmul.f32 %v2806_v40, %v1271_v34  ;;  %v1272_v9 = vmul.f32 0.5, %v1240_v35  ;;  %v1183_v41 = vmul.f32 0.5, %v1147_v4  ;;  %v1148_v43 = vadd.f32 %v2725_v45, %v1067_v36 }
 0x2c9   : > { %v1345_v44 = vadd.f32 %v2818_v47, %v1309_v28  ;;  %v1310_v46 = vmul.f32 %v2806_v40, %v1274_v12  ;;  %2177 = vtanh.f32 %v1185_v39  ;;  %v1186_v24 = vmul.f32 0.5, %v1150_v17  ;;  %v2211_v28 = vld [vmem:[%s2413_s18 + $0xa0] sm:$0xff] }
 0x2ca   : > { %v2170_v26 = vpop.eup %2169  ;;  %v1343_v48 = vadd.f32 %v2818_v47, %v1307_v15  ;;  %v1308_v10 = vmul.f32 %v2806_v40, %v1272_v9  ;;  %2179 = vtanh.f32 %v1183_v41  ;;  %v1184_v49 = vmul.f32 0.5, %v1148_v43 }
 0x2cb   : > { %v2172_v51 = vpop.eup %2171  ;;  %v1447_v30 = vadd.f32 %v2787_v33, %v1345_v44  ;;  %1676 = vst.msk [vmem:[%s2828_s27 + $0x50] sm:$0xff] %vm1501_vm2, %v1345_v44  ;;  %v1346_v55 = vadd.f32 %v2818_v47, %v1310_v46  ;;  %v1245_v13 = vadd.f32 1.0, %v2170_v26  ;;  %2181 = vtanh.f32 %v1186_v24  ;;  %v2118_v58 = vpop.f32.mrb[36].mxu0 }
 0x2cc   : > { %v1445_v32 = vadd.f32 %v2779_v29, %v1343_v48  ;;  %1674 = vst.msk [vmem:[%s2828_s27 + $0x40] sm:$0xff] %vm1501_vm2, %v1343_v48  ;;  %v1344_v59 = vadd.f32 %v2818_v47, %v1308_v10  ;;  %v1243_v60 = vadd.f32 1.0, %v2172_v51  ;;  %2183 = vtanh.f32 %v1184_v49  ;;  %v1080_v62 = vpop.f32.mrb[37].mxu0 }
 0x2cd   : > { %v2174_v2 = vpop.eup %2173  ;;  %1708 = vst.msk [vmem:[%s2841_s7 + $0x50] sm:$0xff] %vm1501_vm2, %v1447_v30  ;;  %v1448_v33 = vadd.f32 %v2783_v0, %v1346_v55  ;;  %1677 = vst.msk [vmem:[%s2828_s27 + $0x58] sm:$0xff] %vm1501_vm2, %v1346_v55  ;;  %v1277_v42 = vmul.f32 0.5, %v1245_v13  ;;  %v1153_v3 = vadd.f32 %v2118_v58, %v2725_v45  ;;  %v1151_v29 = vadd.f32 %v2725_v45, %v1080_v62  ;;  %v2119_v7 = vpop.f32.mrb[38].mxu0 }
 0x2ce   : > { %v2176_v8 = vpop.eup %2175  ;;  %1706 = vst.msk [vmem:[%s2841_s7 + $0x40] sm:$0xff] %vm1501_vm2, %v1445_v32  ;;  %v1446_v14 = vadd.f32 %v2771_v20, %v1344_v59  ;;  %1675 = vst.msk [vmem:[%s2828_s27 + $0x48] sm:$0xff] %vm1501_vm2, %v1344_v59  ;;  %v1275_v57 = vmul.f32 0.5, %v1243_v60  ;;  %v1246_v31 = vadd.f32 1.0, %v2174_v2  ;;  %v1154_v0 = vadd.f32 %v2119_v7, %v2725_v45  ;;  %v1083_v38 = vpop.f32.mrb[39].mxu0  ;;  %v2212_v7 = vld [vmem:[%s2413_s18 + $0xb0] sm:$0xff] }
 0x2cf   : > { %1709 = vst.msk [vmem:[%s2841_s7 + $0x58] sm:$0xff] %vm1501_vm2, %v1448_v33  ;;  %v1313_v52 = vmul.f32 %v2806_v40, %v1277_v42  ;;  %v1244_v21 = vadd.f32 1.0, %v2176_v8  ;;  %v1189_v53 = vmul.f32 0.5, %v1153_v3  ;;  %v1187_v50 = vmul.f32 0.5, %v1151_v29 }
 0x2d0   : > { %1707 = vst.msk [vmem:[%s2841_s7 + $0x48] sm:$0xff] %vm1501_vm2, %v1446_v14  ;;  %v1311_v20 = vmul.f32 %v2806_v40, %v1275_v57  ;;  %v1278_v22 = vmul.f32 0.5, %v1246_v31  ;;  %v1190_v37 = vmul.f32 0.5, %v1154_v0  ;;  %v1152_v63 = vadd.f32 %v2725_v45, %v1083_v38 }
 0x2d1   : > { %v2943_v16 = vmul.f32 %v2210_v25, %v2731_v61  ;;  %v1349_v27 = vadd.f32 %v2818_v47, %v1313_v52  ;;  %v1276_v5 = vmul.f32 0.5, %v1244_v21  ;;  %2185 = vtanh.f32 %v1189_v53 }
 0x2d2   : > { %v1347_v34 = vadd.f32 %v2818_v47, %v1311_v20  ;;  %v1314_v35 = vmul.f32 %v2806_v40, %v1278_v22  ;;  %2187 = vtanh.f32 %v1187_v50  ;;  %v1188_v4 = vmul.f32 0.5, %v1152_v63 }
 0x2d3   : > { %v2178_v36 = vpop.eup %2177  ;;  %v2950_v12 = vmul.f32 %v2211_v28, %v2731_v61  ;;  %v1451_v39 = vadd.f32 %v2804_v54, %v1349_v27  ;;  %1680 = vst.msk [vmem:[%s2828_s27 + $0x70] sm:$0xff] %vm1501_vm2, %v1349_v27  ;;  %v1312_v17 = vmul.f32 %v2806_v40, %v1276_v5  ;;  %2189 = vtanh.f32 %v1190_v37  ;;  %v2122_v15 = vpop.f32.mrb[40].mxu0 }
 0x2d4   : > { %v2180_v9 = vpop.eup %2179  ;;  %v1449_v41 = vadd.f32 %v2796_v6, %v1347_v34  ;;  %1678 = vst.msk [vmem:[%s2828_s27 + $0x60] sm:$0xff] %vm1501_vm2, %v1347_v34  ;;  %v1350_v43 = vadd.f32 %v2818_v47, %v1314_v35  ;;  %v1249_v44 = vadd.f32 1.0, %v2178_v36  ;;  %2191 = vtanh.f32 %v1188_v4  ;;  %v1096_v46 = vpop.f32.mrb[41].mxu0 }
 0x2d5   : > { %v2182_v24 = vpop.eup %2181  ;;  %1712 = vst.msk [vmem:[%s2841_s7 + $0x70] sm:$0xff] %vm1501_vm2, %v1451_v39  ;;  %v1348_v54 = vadd.f32 %v2818_v47, %v1312_v17  ;;  %v1247_v26 = vadd.f32 1.0, %v2180_v9  ;;  %v1157_v48 = vadd.f32 %v2122_v15, %v2725_v45  ;;  %v1155_v6 = vadd.f32 %v2725_v45, %v1096_v46  ;;  %v2123_v10 = vpop.f32.mrb[42].mxu0 }
 0x2d6   : > { %v2184_v49 = vpop.eup %2183  ;;  %1710 = vst.msk [vmem:[%s2841_s7 + $0x60] sm:$0xff] %vm1501_vm2, %v1449_v41  ;;  %v1452_v51 = vadd.f32 %v2800_v11, %v1350_v43  ;;  %1681 = vst.msk [vmem:[%s2828_s27 + $0x78] sm:$0xff] %vm1501_vm2, %v1350_v43  ;;  %v1281_v30 = vmul.f32 0.5, %v1249_v44  ;;  %v1250_v55 = vadd.f32 1.0, %v2182_v24  ;;  %v1158_v13 = vadd.f32 %v2123_v10, %v2725_v45  ;;  %v1099_v58 = vpop.f32.mrb[43].mxu0 }
 0x2d7   : > { %v1450_v32 = vadd.f32 %v2792_v56, %v1348_v54  ;;  %1679 = vst.msk [vmem:[%s2828_s27 + $0x68] sm:$0xff] %vm1501_vm2, %v1348_v54  ;;  %v1279_v59 = vmul.f32 0.5, %v1247_v26  ;;  %v1248_v60 = vadd.f32 1.0, %v2184_v49  ;;  %v1193_v62 = vmul.f32 0.5, %v1157_v48  ;;  %v2213_v26 = vld [vmem:[%s2413_s18 + $0xb8] sm:$0xff] }
 0x2d8   : > { %1713 = vst.msk [vmem:[%s2841_s7 + $0x78] sm:$0xff] %vm1501_vm2, %v1452_v51  ;;  %v1317_v11 = vmul.f32 %v2806_v40, %v1281_v30  ;;  %v1282_v2 = vmul.f32 0.5, %v1250_v55  ;;  %v1191_v33 = vmul.f32 0.5, %v1155_v6  ;;  %v1194_v42 = vmul.f32 0.5, %v1158_v13 }
 0x2d9   : > { %1711 = vst.msk [vmem:[%s2841_s7 + $0x68] sm:$0xff] %vm1501_vm2, %v1450_v32  ;;  %v1315_v3 = vmul.f32 %v2806_v40, %v1279_v59  ;;  %v1280_v29 = vmul.f32 0.5, %v1248_v60  ;;  %2193 = vtanh.f32 %v1193_v62  ;;  %v1156_v56 = vadd.f32 %v2725_v45, %v1099_v58 }
 0x2da   : > { %v1427_v8 = vmul.f32 %v2212_v7, %v2731_v61  ;;  %v1353_v14 = vadd.f32 %v2818_v47, %v1317_v11  ;;  %v1318_v57 = vmul.f32 %v2806_v40, %v1282_v2  ;;  %2195 = vtanh.f32 %v1191_v33  ;;  %v2214_v7 = vld [vmem:[%s2413_s18 + $0xd0] sm:$0xff] }
 0x2db   : > { %v2186_v31 = vpop.eup %2185  ;;  %v1351_v0 = vadd.f32 %v2818_v47, %v1315_v3  ;;  %v1316_v38 = vmul.f32 %v2806_v40, %v1280_v29  ;;  %2197 = vtanh.f32 %v1194_v42  ;;  %v1192_v52 = vmul.f32 0.5, %v1156_v56  ;;  %v2126_v21 = vpop.f32.mrb[44].mxu0 }
 0x2dc   : > { %v2188_v53 = vpop.eup %2187  ;;  %v1455_v50 = vadd.f32 %v2877_v1, %v1353_v14  ;;  %1684 = vst.msk [vmem:[%s2828_s27 + $0x90] sm:$0xff] %vm1501_vm2, %v1353_v14  ;;  %v1354_v20 = vadd.f32 %v2818_v47, %v1318_v57  ;;  %v1253_v22 = vadd.f32 1.0, %v2186_v31  ;;  %v1161_v37 = vadd.f32 %v2126_v21, %v2725_v45  ;;  %v1112_v63 = vpop.f32.mrb[45].mxu0  ;;  %v2216_v21 = vld [vmem:[%s2413_s18 + $0xd8] sm:$0xff] }
 0x2dd   : > { %v2190_v25 = vpop.eup %2189  ;;  %v1453_v27 = vadd.f32 %v2814_v23, %v1351_v0  ;;  %1682 = vst.msk [vmem:[%s2828_s27 + $0x80] sm:$0xff] %vm1501_vm2, %v1351_v0  ;;  %v1352_v5 = vadd.f32 %v2818_v47, %v1316_v38  ;;  %v1251_v34 = vadd.f32 1.0, %v2188_v53  ;;  %2199 = vtanh.f32 %v1192_v52  ;;  %v2127_v1 = vpop.f32.mrb[46].mxu0  ;;  %v2215_v0 = vld [vmem:[%s2413_s18 + $0xc0] sm:$0xff] }
 0x2de   : > { %v2192_v35 = vpop.eup %2191  ;;  %1716 = vst.msk [vmem:[%s2841_s7 + $0x90] sm:$0xff] %vm1501_vm2, %v1455_v50  ;;  %v1456_v4 = vadd.f32 %v2835_v19, %v1354_v20  ;;  %1685 = vst.msk [vmem:[%s2828_s27 + $0x98] sm:$0xff] %vm1501_vm2, %v1354_v20  ;;  %v1285_v36 = vmul.f32 0.5, %v1253_v22  ;;  %v1254_v28 = vadd.f32 1.0, %v2190_v25  ;;  %v1197_v23 = vmul.f32 0.5, %v1161_v37  ;;  %v1115_v39 = vpop.f32.mrb[47].mxu0 }
 0x2df   : > { %1714 = vst.msk [vmem:[%s2841_s7 + $0x80] sm:$0xff] %vm1501_vm2, %v1453_v27  ;;  %v1454_v17 = vadd.f32 %v2810_v18, %v1352_v5  ;;  %1683 = vst.msk [vmem:[%s2828_s27 + $0x88] sm:$0xff] %vm1501_vm2, %v1352_v5  ;;  %v1283_v15 = vmul.f32 0.5, %v1251_v34  ;;  %v1252_v9 = vadd.f32 1.0, %v2192_v35  ;;  %v1159_v41 = vadd.f32 %v2725_v45, %v1112_v63  ;;  %v2217_v25 = vld [vmem:[%s2413_s18 + $0xc8] sm:$0xff] }
 0x2e0   : > { %1717 = vst.msk [vmem:[%s2841_s7 + $0x98] sm:$0xff] %vm1501_vm2, %v1456_v4  ;;  %v1321_v19 = vmul.f32 %v2806_v40, %v1285_v36  ;;  %v1286_v43 = vmul.f32 0.5, %v1254_v28  ;;  %2201 = vtanh.f32 %v1197_v23  ;;  %v1162_v44 = vadd.f32 %v2127_v1, %v2725_v45 }
 0x2e1   : > { %1715 = vst.msk [vmem:[%s2841_s7 + $0x88] sm:$0xff] %vm1501_vm2, %v1454_v17  ;;  %v1319_v46 = vmul.f32 %v2806_v40, %v1283_v15  ;;  %v1284_v18 = vmul.f32 0.5, %v1252_v9  ;;  %v1195_v24 = vmul.f32 0.5, %v1159_v41  ;;  %v1160_v54 = vadd.f32 %v2725_v45, %v1115_v39  ;;  %v2218_v9 = vld [vmem:[%s2413_s18 + $0xf0] sm:$0xff] }
 0x2e2   : > { %v1428_v48 = vmul.f32 %v2213_v26, %v2731_v61  ;;  %v1357_v6 = vadd.f32 %v2818_v47, %v1321_v19  ;;  %v1322_v10 = vmul.f32 %v2806_v40, %v1286_v43  ;;  %v1198_v49 = vmul.f32 0.5, %v1162_v44  ;;  %v2219_v26 = vld [vmem:[%s2413_s18 + $0xe0] sm:$0xff] }
 0x2e3   : > { %v2194_v51 = vpop.eup %2193  ;;  %v1355_v30 = vadd.f32 %v2818_v47, %v1319_v46  ;;  %v1320_v55 = vmul.f32 %v2806_v40, %v1284_v18  ;;  %2203 = vtanh.f32 %v1195_v24  ;;  %v1196_v13 = vmul.f32 0.5, %v1160_v54 }
 0x2e4   : > { %v2196_v58 = vpop.eup %2195  ;;  %v1459_v45 = vadd.f32 %v1427_v8, %v1357_v6  ;;  %1688 = vst.msk [vmem:[%s2828_s27 + $0xb0] sm:$0xff] %vm1501_vm2, %v1357_v6  ;;  %v1358_v32 = vadd.f32 %v2818_v47, %v1322_v10  ;;  %v1257_v59 = vadd.f32 1.0, %v2194_v51  ;;  %2205 = vtanh.f32 %v1198_v49  ;;  %v2220_v49 = vld [vmem:[%s2413_s18 + $0xf8] sm:$0xff] }
 0x2e5   : > { %v2198_v60 = vpop.eup %2197  ;;  %v1457_v62 = vadd.f32 %v2950_v12, %v1355_v30  ;;  %1686 = vst.msk [vmem:[%s2828_s27 + $0xa0] sm:$0xff] %vm1501_vm2, %v1355_v30  ;;  %v1356_v11 = vadd.f32 %v2818_v47, %v1320_v55  ;;  %v1255_v2 = vadd.f32 1.0, %v2196_v58  ;;  %2207 = vtanh.f32 %v1196_v13  ;;  %v2221_v13 = vld [vmem:[%s2413_s18 + $0xe8] sm:$0xff] }
 0x2e6   : > { %1720 = vst.msk [vmem:[%s2841_s7 + $0xb0] sm:$0xff] %vm1501_vm2, %v1459_v45  ;;  %v1460_v33 = vadd.f32 %v1428_v48, %v1358_v32  ;;  %1689 = vst.msk [vmem:[%s2828_s27 + $0xb8] sm:$0xff] %vm1501_vm2, %v1358_v32  ;;  %v1289_v42 = vmul.f32 0.5, %v1257_v59  ;;  %v1258_v3 = vadd.f32 1.0, %v2198_v60  ;;  %v1431_v8 = vmul.f32 %v2214_v7, %v2731_v61 }
 0x2e7   : > { %v2200_v29 = vpop.eup %2199  ;;  %1718 = vst.msk [vmem:[%s2841_s7 + $0xa0] sm:$0xff] %vm1501_vm2, %v1457_v62  ;;  %v1458_v12 = vadd.f32 %v2943_v16, %v1356_v11  ;;  %1687 = vst.msk [vmem:[%s2828_s27 + $0xa8] sm:$0xff] %vm1501_vm2, %v1356_v11  ;;  %v1287_v56 = vmul.f32 0.5, %v1255_v2  ;;  %v1429_v38 = vmul.f32 %v2215_v0, %v2731_v61  ;;  %v1432_v53 = vmul.f32 %v2216_v21, %v2731_v61 }
 0x2e8   : > { %1721 = vst.msk [vmem:[%s2841_s7 + $0xb8] sm:$0xff] %vm1501_vm2, %v1460_v33  ;;  %v1325_v14 = vmul.f32 %v2806_v40, %v1289_v42  ;;  %v1290_v57 = vmul.f32 0.5, %v1258_v3  ;;  %v1256_v31 = vadd.f32 1.0, %v2200_v29  ;;  %v1430_v27 = vmul.f32 %v2217_v25, %v2731_v61 }
 0x2e9   : > { %1719 = vst.msk [vmem:[%s2841_s7 + $0xa8] sm:$0xff] %vm1501_vm2, %v1458_v12  ;;  %v1323_v16 = vmul.f32 %v2806_v40, %v1287_v56  ;;  %v1435_v41 = vmul.f32 %v2218_v9, %v2731_v61  ;;  %v1433_v48 = vmul.f32 %v2219_v26, %v2731_v61  ;;  %v1436_v51 = vmul.f32 %v2220_v49, %v2731_v61 }
 0x2ea   : > { %v2202_v52 = vpop.eup %2201  ;;  %v1361_v50 = vadd.f32 %v2818_v47, %v1325_v14  ;;  %v1326_v20 = vmul.f32 %v2806_v40, %v1290_v57  ;;  %v1288_v22 = vmul.f32 0.5, %v1256_v31  ;;  %v1434_v58 = vmul.f32 %v2221_v13, %v2731_v61 }
 0x2eb   : > { %v1359_v37 = vadd.f32 %v2818_v47, %v1323_v16  ;;  %v1261_v63 = vadd.f32 1.0, %v2202_v52 }
 0x2ec   : > { %v1463_v5 = vadd.f32 %v1431_v8, %v1361_v50  ;;  %1692 = vst.msk [vmem:[%s2828_s27 + $0xd0] sm:$0xff] %vm1501_vm2, %v1361_v50  ;;  %v1362_v34 = vadd.f32 %v2818_v47, %v1326_v20  ;;  %v1324_v1 = vmul.f32 %v2806_v40, %v1288_v22 }
 0x2ed   : > { %v2204_v35 = vpop.eup %2203  ;;  %v1461_v4 = vadd.f32 %v1429_v38, %v1359_v37  ;;  %1690 = vst.msk [vmem:[%s2828_s27 + $0xc0] sm:$0xff] %vm1501_vm2, %v1359_v37  ;;  %v1293_v36 = vmul.f32 0.5, %v1261_v63 }
 0x2ee   : > { %v2206_v28 = vpop.eup %2205  ;;  %1724 = vst.msk [vmem:[%s2841_s7 + $0xd0] sm:$0xff] %vm1501_vm2, %v1463_v5  ;;  %v1464_v23 = vadd.f32 %v1432_v53, %v1362_v34  ;;  %1693 = vst.msk [vmem:[%s2828_s27 + $0xd8] sm:$0xff] %vm1501_vm2, %v1362_v34  ;;  %v1360_v39 = vadd.f32 %v2818_v47, %v1324_v1  ;;  %v1259_v17 = vadd.f32 1.0, %v2204_v35 }
 0x2ef   : > { %v2208_v15 = vpop.eup %2207  ;;  %1722 = vst.msk [vmem:[%s2841_s7 + $0xc0] sm:$0xff] %vm1501_vm2, %v1461_v4  ;;  %v1329_v19 = vmul.f32 %v2806_v40, %v1293_v36  ;;  %v1262_v43 = vadd.f32 1.0, %v2206_v28 }
 0x2f0   : > { %1725 = vst.msk [vmem:[%s2841_s7 + $0xd8] sm:$0xff] %vm1501_vm2, %v1464_v23  ;;  %v1462_v44 = vadd.f32 %v1430_v27, %v1360_v39  ;;  %1691 = vst.msk [vmem:[%s2828_s27 + $0xc8] sm:$0xff] %vm1501_vm2, %v1360_v39  ;;  %v1291_v46 = vmul.f32 0.5, %v1259_v17  ;;  %v1260_v18 = vadd.f32 1.0, %v2208_v15 }
 0x2f1   : > { %v1365_v24 = vadd.f32 %v2818_v47, %v1329_v19  ;;  %v1294_v54 = vmul.f32 0.5, %v1262_v43 }
 0x2f2   : > { %1723 = vst.msk [vmem:[%s2841_s7 + $0xc8] sm:$0xff] %vm1501_vm2, %v1462_v44  ;;  %v1327_v6 = vmul.f32 %v2806_v40, %v1291_v46  ;;  %v1292_v10 = vmul.f32 0.5, %v1260_v18 }
 0x2f3   : > { %v1467_v30 = vadd.f32 %v1435_v41, %v1365_v24  ;;  %1696 = vst.msk [vmem:[%s2828_s27 + $0xf0] sm:$0xff] %vm1501_vm2, %v1365_v24  ;;  %v1330_v55 = vmul.f32 %v2806_v40, %v1294_v54 }
 0x2f4   : > { %v1363_v45 = vadd.f32 %v2818_v47, %v1327_v6  ;;  %v1328_v32 = vmul.f32 %v2806_v40, %v1292_v10 }
 0x2f5   : > { %1728 = vst.msk [vmem:[%s2841_s7 + $0xf0] sm:$0xff] %vm1501_vm2, %v1467_v30  ;;  %v1366_v59 = vadd.f32 %v2818_v47, %v1330_v55 }
 0x2f6   : > { %v1465_v60 = vadd.f32 %v1433_v48, %v1363_v45  ;;  %1694 = vst.msk [vmem:[%s2828_s27 + $0xe0] sm:$0xff] %vm1501_vm2, %v1363_v45  ;;  %v1364_v62 = vadd.f32 %v2818_v47, %v1328_v32 }
 0x2f7   : > { %v1468_v11 = vadd.f32 %v1436_v51, %v1366_v59  ;;  %1697 = vst.msk [vmem:[%s2828_s27 + $0xf8] sm:$0xff] %vm1501_vm2, %v1366_v59 }
 0x2f8   : > { %1726 = vst.msk [vmem:[%s2841_s7 + $0xe0] sm:$0xff] %vm1501_vm2, %v1465_v60  ;;  %v1466_v2 = vadd.f32 %v1434_v58, %v1364_v62  ;;  %1695 = vst.msk [vmem:[%s2828_s27 + $0xe8] sm:$0xff] %vm1501_vm2, %v1364_v62 }
 0x2f9   : > { %1729 = vst.msk [vmem:[%s2841_s7 + $0xf8] sm:$0xff] %vm1501_vm2, %v1468_v11 }
 0x2fa   : > { %1727 = vst.msk [vmem:[%s2841_s7 + $0xe8] sm:$0xff] %vm1501_vm2, %v1466_v2 }
 0x2fb PF: > { %s17_s21 = sadd.s32 1, %s2228_s21  }
 0x2fc   : > { %p14_p4 = scmp.ge.s32.totalorder %s17_s21, 6  }
 0x2fe   :  { %16 = sbr.rel (!%p14_p4) target bundleno = 1 (0x1), region = 93 }

</bundles_post_ra>
